<compile_context>
chip_gen: v7x
topology: tpu7x:2x2x1
jax: 0.10.0
libtpu: 0.0.40
codegen_flags: <defaults>
</compile_context>

<pallas_src>
import functools
import math

import jax
import jax.numpy as jnp
from jax.experimental import pallas as pl
from jax.experimental.pallas import tpu as pltpu


def _round_up(x, m):
    return ((x + m - 1) // m) * m


def _device_vmem_and_cores():
    """(per-core VMEM bytes, probably-multi-TensorCore?) with safe fallback."""
    try:
        cap = int(pltpu.get_tpu_info().vmem_capacity_bytes)
    except Exception:           # API mismatch -> conservative (v7x-like) limits
        cap = 64 * 2 ** 20
    return cap, cap <= 64 * 2 ** 20     # 64 MiB/TC == v7x (2 TensorCores)


def _estimate_block_vmem(tb, n, hp, mm_itemsize):
    """Rough per-grid-block VMEM footprint (inputs double-buffered + live
    per-step intermediates), used only for tile sizing / vmem_limit."""
    g = 3 * hp
    m = tb * n
    a_bytes = 2 * m * 2 * n * mm_itemsize            # A block (double-buffered)
    out_bytes = 2 * m * hp * 4                       # output block
    gather_bytes = m * hp * 4                        # gather scratch
    weight_bytes = 2 * (hp * 3 * g * mm_itemsize + 4 * g * 4)
    interm_bytes = m * (3 * g * 4 + 2 * g * mm_itemsize + g * 4 + 12 * hp * 4)
    return int(a_bytes + out_bytes + gather_bytes + weight_bytes + interm_bytes)


def _pick_batch_tile(B, N, Hp, mm_itemsize, vmem_cap, multi_core):
    """Sessions per grid step: as large as VMEM allows; keep >=2 blocks on
    2-TensorCore chips so dimension_semantics=('parallel',) uses both cores."""
    row_cap = 1024 if multi_core else 2048
    budget = int(0.45 * vmem_cap)

    def shape_ok(tb):           # (TB*N, Hp) blocks need TB*N % 8 == 0 (or full)
        return tb == B or (tb * N) % 8 == 0

    candidates = sorted([d for d in range(1, B + 1) if B % d == 0], reverse=True)
    for tb in candidates:
        if not shape_ok(tb):
            continue
        if multi_core and B >= 2 and B // tb < 2:
            continue
        if tb * N > row_cap:
            continue
        if _estimate_block_vmem(tb, N, Hp, mm_itemsize) > budget:
            continue
        return tb
    for tb in candidates:       # relax row cap / megacore, keep shape + VMEM
        if shape_ok(tb) and _estimate_block_vmem(tb, N, Hp, mm_itemsize) <= budget:
            return tb
    return B                    # last resort: whole batch in one block


# -----------------------------------------------------------------------------
# Host-side parameter preparation (done once, not per forward call)
# -----------------------------------------------------------------------------
def _fuse_gnn_weights(params, Hp, mm_dtype):
    """Fold linear_edge_{in,out} and the per-gate w_ih halves into one
    (Hp, 9*Hp) matmul operand + two bias rows (all lane-padded per gate)."""
    H = int(params["w_hh"].shape[1])
    G = 3 * Hp
    w_ih = params["w_ih"].astype(jnp.float32)
    w_hh = params["w_hh"].astype(jnp.float32)

    gi_in = w_ih[:, :H].T            # (H, 3H): input_in  -> gates
    gi_out = w_ih[:, H:2 * H].T      # (H, 3H): input_out -> gates
    gh = w_hh.T                      # (H, 3H): hidden    -> gates

    m_in = params["w_edge_in"].T @ gi_in        # h @ m_in  == edge_in  @ gi_in
    m_out = params["w_edge_out"].T @ gi_out     # h @ m_out == edge_out @ gi_out
    c_in = params["b_edge_in"] @ gi_in          # propagated through A_in
    c_out = params["b_edge_out"] @ gi_out       # propagated through A_out
    b_post = (params["b_iah"] @ gi_in + params["b_oah"] @ gi_out
              + params["b_ih"])                 # added after propagation

    pad_h = Hp - H

    def pad_gate_mat(m):             # (H, 3H) -> (Hp, 3*Hp), gates 128-aligned
        blocks = [jnp.pad(m[:, g * H:(g + 1) * H], ((0, pad_h), (0, pad_h)))
                  for g in range(3)]
        return jnp.concatenate(blocks, axis=1)

    def pad_gate_vec(v):             # (3H,) -> (1, 3*Hp)
        blocks = [jnp.pad(v[g * H:(g + 1) * H], (0, pad_h)) for g in range(3)]
        return jnp.concatenate(blocks).reshape(1, G)

    wbig = jnp.concatenate(
        [pad_gate_mat(m_in), pad_gate_mat(m_out), pad_gate_mat(gh)], axis=1)
    bbig = jnp.concatenate(
        [pad_gate_vec(c_in), pad_gate_vec(c_out), pad_gate_vec(params["b_hh"])],
        axis=1)
    bconst = pad_gate_vec(b_post)

    return (wbig.astype(mm_dtype),                    # (Hp, 9*Hp)
            bbig.astype(jnp.float32),                 # (1, 9*Hp)
            bconst.astype(jnp.float32))               # (1, 3*Hp)


def prepare_session_params(params, *, matmul_dtype=jnp.bfloat16,
                           lane_multiple=128):
    """One-time device-side prep: fuse/cast GNN weights and lane-pad the
    embedding table so gathered rows / outputs are lane-dense."""
    H = int(params["w_hh"].shape[1])
    Hp = _round_up(H, lane_multiple)
    wbig, bbig, bconst = _fuse_gnn_weights(params, Hp, matmul_dtype)
    emb_pad = jnp.pad(params["embedding"].astype(jnp.float32),
                      ((0, 0), (0, Hp - H)))
    return {"emb_pad": emb_pad, "wbig": wbig, "bbig": bbig, "bconst": bconst,
            "hidden_size": H, "hidden_pad": Hp, "mm_dtype": matmul_dtype}


# -----------------------------------------------------------------------------
# Kernel: embedding DMA-gather + fused L2-norm + gated-graph GNN (`step` iters)
# -----------------------------------------------------------------------------
def _gnn_kernel(idx_ref, emb_ref, a_ref, wbig_ref, bbig_ref, bconst_ref,
                out_ref, gather_ref, dma_sem,
                *, step, n_nodes, batch_tile, norm, mm_dtype, hidden_pad):
    N = n_nodes
    TB = batch_tile
    Hp = hidden_pad
    G = 3 * Hp
    M = TB * N

    # ---- in-kernel embedding gather: one row DMA per node of this block ----
    base = pl.program_id(0) * M
    sem = dma_sem.at[0]

    def _issue(r):
        row = idx_ref[base + r]
        pltpu.make_async_copy(emb_ref.at[pl.ds(row, 1), :],
                              gather_ref.at[pl.ds(r, 1), :], sem).start()

    def _drain():
        # All copies are the same size; each wait consumes one completion.
        pltpu.make_async_copy(emb_ref.at[pl.ds(0, 1), :],
                              gather_ref.at[pl.ds(0, 1), :], sem).wait()

    if M <= 64:                      # small blocks: unroll for the scheduler
        for r in range(M):
            _issue(r)
        for _ in range(M):
            _drain()
    else:
        def _issue_body(r, carry):
            _issue(r)
            return carry

        def _drain_body(r, carry):
            _drain()
            return carry

        jax.lax.fori_loop(0, M, _issue_body, 0)
        jax.lax.fori_loop(0, M, _drain_body, 0)

    h = gather_ref[...].astype(jnp.float32)            # (M, Hp), padded lanes 0

    # Fused NISER+ L2 normalization of the gathered embedding rows.
    # NOTE: eps-clamped (zero rows -> 0) vs exact division in the reference.
    if norm:
        sq = jnp.sum(h * h, axis=-1, keepdims=True)
        h = h * jax.lax.rsqrt(jnp.maximum(sq, 1e-24))

    # ---- hoisted loads (reused across all `step` iterations) ----
    a = a_ref[...]                                     # (TB, N, 2N), mm_dtype
    a_in = a[:, :, :N]
    a_out = a[:, :, N:]
    wbig = wbig_ref[...]                               # (Hp, 3G), mm_dtype
    bbig = bbig_ref[...]                               # (1, 3G), f32
    bconst = bconst_ref[...]                           # (1, G),  f32

    def gnn_step(hcur):
        hm = hcur.astype(mm_dtype)
        # single node-wise MXU dot: columns = [gi_in-proj | gi_out-proj | gh]
        p = jnp.dot(hm, wbig, preferred_element_type=jnp.float32) + bbig
        p_in = p[:, :G].reshape(TB, N, G).astype(mm_dtype)
        p_out = p[:, G:2 * G].reshape(TB, N, G).astype(mm_dtype)
        gh = p[:, 2 * G:]                              # (M, G), f32
        # per-session graph propagation (already in gate space)
        gi = (jnp.einsum("bij,bjg->big", a_in, p_in,
                         preferred_element_type=jnp.float32)
              + jnp.einsum("bij,bjg->big", a_out, p_out,
                           preferred_element_type=jnp.float32)
              ).reshape(M, G) + bconst
        # gate math in f32; slices are 128-aligned
        i_r, i_i, i_n = gi[:, :Hp], gi[:, Hp:2 * Hp], gi[:, 2 * Hp:]
        h_r, h_i, h_n = gh[:, :Hp], gh[:, Hp:2 * Hp], gh[:, 2 * Hp:]
        resetgate = jax.nn.sigmoid(i_r + h_r)
        inputgate = jax.nn.sigmoid(i_i + h_i)
        newgate = jnp.tanh(i_n + resetgate * h_n)
        return newgate + inputgate * (hcur - newgate)  # padded lanes stay 0

    if step == 1:
        h = gnn_step(h)
    elif step > 1:
        h = jax.lax.fori_loop(0, step, lambda _, hh: gnn_step(hh), h)

    out_ref[...] = h.astype(out_ref.dtype)             # lane-dense store


# -----------------------------------------------------------------------------
# SessionGraph.forward(inputs, A)
# -----------------------------------------------------------------------------
def session_graph_forward(prep, inputs, A, *, norm=True, step=1):
    B, N = inputs.shape
    assert A.shape == (B, N, 2 * N)
    H, Hp = prep["hidden_size"], prep["hidden_pad"]
    mm_dtype = prep["mm_dtype"]
    G = 3 * Hp
    mm_itemsize = jnp.dtype(mm_dtype).itemsize

    vmem_cap, multi_core = _device_vmem_and_cores()
    TB = _pick_batch_tile(B, N, Hp, mm_itemsize, vmem_cap, multi_core)
    grid = (B // TB,)
    M = TB * N

    # per-call glue: cast A once, flatten indices for SMEM scalar prefetch
    a_cast = A.astype(mm_dtype)
    idx_flat = inputs.reshape(-1).astype(jnp.int32)
    # TODO(synk): nn.Dropout(0.1) after the embedding is identity in eval mode;
    #             training-mode stochastic dropout not implemented here.

    est = _estimate_block_vmem(TB, N, Hp, mm_itemsize)
    vmem_limit = int(min(max(2 * est, 32 * 2 ** 20), int(0.9 * vmem_cap)))

    kernel = functools.partial(
        _gnn_kernel, step=step, n_nodes=N, batch_tile=TB, norm=norm,
        mm_dtype=mm_dtype, hidden_pad=Hp)

    grid_spec = pltpu.PrefetchScalarGridSpec(
        num_scalar_prefetch=1,                               # item indices
        grid=grid,
        in_specs=[
            pl.BlockSpec(memory_space=pl.ANY),               # embedding (HBM)
            pl.BlockSpec((TB, N, 2 * N), lambda b, idx: (b, 0, 0)),   # A
            pl.BlockSpec((Hp, 3 * G), lambda b, idx: (0, 0)),         # fused W
            pl.BlockSpec((1, 3 * G), lambda b, idx: (0, 0)),          # pre-prop b
            pl.BlockSpec((1, G), lambda b, idx: (0, 0)),              # post-prop b
        ],
        out_specs=pl.BlockSpec((M, Hp), lambda b, idx: (b, 0)),
        scratch_shapes=[
            pltpu.VMEM((M, Hp), jnp.float32),                # gather buffer
            pltpu.SemaphoreType.DMA((1,)),
        ],
    )

    out_flat = pl.pallas_call(
        kernel,
        out_shape=jax.ShapeDtypeStruct((B * N, Hp), prep["emb_pad"].dtype),
        grid_spec=grid_spec,
        compiler_params=pltpu.CompilerParams(
            dimension_semantics=("parallel",),
            vmem_limit_bytes=vmem_limit),
    )(idx_flat, prep["emb_pad"], a_cast,
      prep["wbig"], prep["bbig"], prep["bconst"])

    return out_flat[:, :H].reshape(B, N, H)


# -----------------------------------------------------------------------------
# Row-tiled L2 normalization of the embedding table (compute_score path only;
# the forward-path norm is fused into the GNN kernel above).
# -----------------------------------------------------------------------------
def _l2_norm_rows_kernel(x_ref, o_ref):
    x = x_ref[...].astype(jnp.float32)
    sq = jnp.sum(x * x, axis=-1, keepdims=True)
    o_ref[...] = (x * jax.lax.rsqrt(jnp.maximum(sq, 1e-24))).astype(o_ref.dtype)


def normalize_embedding(emb, *, block_rows=8192):
    n_node, width = emb.shape
    block_rows = min(block_rows, n_node)
    if block_rows != n_node:
        block_rows = max(8, (block_rows // 8) * 8)
    grid = (pl.cdiv(n_node, block_rows),)
    vmem_cap, _ = _device_vmem_and_cores()
    est = 4 * 4 * block_rows * width
    limit = int(min(max(2 * est, 16 * 2 ** 20), int(0.9 * vmem_cap)))
    return pl.pallas_call(
        _l2_norm_rows_kernel,
        out_shape=jax.ShapeDtypeStruct((n_node, width), emb.dtype),
        grid=grid,
        in_specs=[pl.BlockSpec((block_rows, width), lambda i: (i, 0))],
        out_specs=pl.BlockSpec((block_rows, width), lambda i: (i, 0)),
        compiler_params=pltpu.CompilerParams(
            dimension_semantics=("parallel",),
            vmem_limit_bytes=limit),
    )(emb)


# -----------------------------------------------------------------------------
# Pure-JAX reference (mirrors the PyTorch GNNCell exactly) for validation
# -----------------------------------------------------------------------------
def _gnn_cell_reference(A, hidden, p):
    N = hidden.shape[1]
    A_in, A_out = A[:, :, :N], A[:, :, N:2 * N]
    edge_in = hidden @ p["w_edge_in"].T + p["b_edge_in"]
    edge_out = hidden @ p["w_edge_out"].T + p["b_edge_out"]
    input_in = jnp.einsum("bij,bjh->bih", A_in, edge_in) + p["b_iah"]
    input_out = jnp.einsum("bij,bjh->bih", A_out, edge_out) + p["b_oah"]
    inputs = jnp.concatenate([input_in, input_out], axis=-1)
    gi = inputs @ p["w_ih"].T + p["b_ih"]
    gh = hidden @ p["w_hh"].T + p["b_hh"]
    i_r, i_i, i_n = jnp.split(gi, 3, axis=-1)
    h_r, h_i, h_n = jnp.split(gh, 3, axis=-1)
    r = jax.nn.sigmoid(i_r + h_r)
    z = jax.nn.sigmoid(i_i + h_i)
    n = jnp.tanh(i_n + r * h_n)
    return n + z * (hidden - n)


def session_graph_forward_reference(params, inputs, A, *, norm=True, step=1):
    emb = params["embedding"]
    if norm:
        emb = emb / jnp.linalg.norm(emb, axis=1, keepdims=True)
    hidden = jnp.take(emb, inputs, axis=0)
    for _ in range(step):
        hidden = _gnn_cell_reference(A, hidden, params)
    return hidden


# -----------------------------------------------------------------------------
# Deterministic parameter init (mirrors reset_parameters: U(-stdv, stdv))
# -----------------------------------------------------------------------------
def init_params(key, n_node, hidden_size):
    H = hidden_size
    stdv = 1.0 / math.sqrt(H)
    names_shapes = [
        ("embedding", (n_node, H)),
        ("w_edge_in", (H, H)), ("b_edge_in", (H,)),
        ("w_edge_out", (H, H)), ("b_edge_out", (H,)),
        ("b_iah", (H,)), ("b_oah", (H,)),
        ("w_ih", (3 * H, 2 * H)), ("b_ih", (3 * H,)),
        ("w_hh", (3 * H, H)), ("b_hh", (3 * H,)),
    ]
    params = {}
    for name, shape in names_shapes:
        key, sub = jax.random.split(key)
        params[name] = jax.random.uniform(
            sub, shape, dtype=jnp.float32, minval=-stdv, maxval=stdv)
    return params


if __name__ == "__main__":
    B, N, H, n_node = 2, 8, 32, 64

    key = jax.random.PRNGKey(0)
    kp, ki, ka = jax.random.split(key, 3)

    params = init_params(kp, n_node, H)

    # session item indices (B, N) and adjacency (B, N, 2N)
    inputs = jax.random.randint(ki, (B, N), 0, n_node, dtype=jnp.int32)
    A_raw = (jax.random.uniform(ka, (B, N, 2 * N)) > 0.6).astype(jnp.float32)
    denom_in = jnp.maximum(jnp.sum(A_raw[:, :, :N], axis=2, keepdims=True), 1.0)
    denom_out = jnp.maximum(jnp.sum(A_raw[:, :, N:], axis=2, keepdims=True), 1.0)
    A = jnp.concatenate(
        [A_raw[:, :, :N] / denom_in, A_raw[:, :, N:] / denom_out], axis=2)

    # one-time prep: fused bf16 weights + lane-padded embedding table
    prep = prepare_session_params(params)

    out = session_graph_forward(prep, inputs, A, norm=True, step=1)
    out = jax.block_until_ready(out)
    assert out.shape == (B, N, H)

    ref = session_graph_forward_reference(params, inputs, A, norm=True, step=1)
    err1 = float(jnp.max(jnp.abs(out - ref)))
    assert err1 < 2e-2, f"step=1 mismatch vs pure-JAX reference: {err1}"

    # multi-step path exercises the in-kernel lax.fori_loop
    out3 = jax.block_until_ready(
        session_graph_forward(prep, inputs, A, norm=True, step=3))
    ref3 = session_graph_forward_reference(params, inputs, A, norm=True, step=3)
    err3 = float(jnp.max(jnp.abs(out3 - ref3)))
    assert err3 < 5e-2, f"step=3 mismatch vs pure-JAX reference: {err3}"

    # row-tiled table-normalization kernel (compute_score path)
    emb_n = jax.block_until_ready(normalize_embedding(params["embedding"]))
    assert emb_n.shape == (n_node, H)

    print("KERNEL_OK")
</pallas_src>

<mosaic_0001>
module attributes {stable_mosaic.version = 11 : i64} {
  func.func @_gnn_kernel(%arg0: i32, %arg1: memref<16xi32, #tpu.memory_space<smem>>, %arg2: memref<64x128xf32, #tpu.memory_space<any>>, %arg3: memref<1x8x16xbf16, #tpu.memory_space<vmem>>, %arg4: memref<128x1152xbf16, #tpu.memory_space<vmem>>, %arg5: memref<1x1152xf32, #tpu.memory_space<vmem>>, %arg6: memref<1x384xf32, #tpu.memory_space<vmem>>, %arg7: memref<8x128xf32, #tpu.memory_space<vmem>>, %arg8: memref<8x128xf32, #tpu.memory_space<vmem>>, %arg9: memref<1x!tpu.dma_semaphore, #tpu.memory_space<semaphore_mem>>) attributes {dimension_semantics = [#tpu.dimension_semantics<parallel>], iteration_bounds = array<i64: 2>, scalar_prefetch = 1 : i64, scratch_operands = 2 : i64, tpu.core_type = #tpu.core_type<tc>, window_params = [{}, {transform_indices = @transform_1, window_bounds = array<i64: 1, 8, 16>}, {pipeline_mode = #tpu.pipeline_mode<synchronous>, transform_indices = @transform_2, window_bounds = array<i64: 128, 1152>}, {pipeline_mode = #tpu.pipeline_mode<synchronous>, transform_indices = @transform_3, window_bounds = array<i64: 1, 1152>}, {pipeline_mode = #tpu.pipeline_mode<synchronous>, transform_indices = @transform_4, window_bounds = array<i64: 1, 384>}, {transform_indices = @transform_5, window_bounds = array<i64: 8, 128>}]} {
    %c8_i32 = arith.constant 8 : i32
    %0 = arith.muli %arg0, %c8_i32 : i32
    %c0_i32 = arith.constant 0 : i32
    %1 = arith.addi %0, %c0_i32 : i32
    %2 = arith.index_cast %1 : i32 to index
    %3 = memref.load %arg1[%2] : memref<16xi32, #tpu.memory_space<smem>>
    %c0_i32_0 = arith.constant 0 : i32
    %c0_i32_1 = arith.constant 0 : i32
    %4 = tpu.memref_slice %arg2[%3, %c0_i32_1] : memref<64x128xf32, #tpu.memory_space<any>> -> memref<1x128xf32, #tpu.memory_space<any>>
    %c0_i32_2 = arith.constant 0 : i32
    %c0_i32_3 = arith.constant 0 : i32
    %5 = tpu.memref_slice %arg8[%c0_i32_2, %c0_i32_3] : memref<8x128xf32, #tpu.memory_space<vmem>> -> memref<1x128xf32, #tpu.memory_space<vmem>>
    %6 = tpu.memref_slice %arg9[%c0_i32_0] : memref<1x!tpu.dma_semaphore, #tpu.memory_space<semaphore_mem>> -> memref<1x!tpu.dma_semaphore, #tpu.memory_space<semaphore_mem>>
    %7 = tpu.memref_squeeze %6 : memref<1x!tpu.dma_semaphore, #tpu.memory_space<semaphore_mem>> -> memref<!tpu.dma_semaphore, #tpu.memory_space<semaphore_mem>>
    tpu.enqueue_dma source(%4 : memref<1x128xf32, #tpu.memory_space<any>>) target(%5 : memref<1x128xf32, #tpu.memory_space<vmem>>) target_semaphore(%7 : memref<!tpu.dma_semaphore, #tpu.memory_space<semaphore_mem>>)
    %c1_i32 = arith.constant 1 : i32
    %8 = arith.addi %0, %c1_i32 : i32
    %9 = arith.index_cast %8 : i32 to index
    %10 = memref.load %arg1[%9] : memref<16xi32, #tpu.memory_space<smem>>
    %c0_i32_4 = arith.constant 0 : i32
    %c0_i32_5 = arith.constant 0 : i32
    %11 = tpu.memref_slice %arg2[%10, %c0_i32_5] : memref<64x128xf32, #tpu.memory_space<any>> -> memref<1x128xf32, #tpu.memory_space<any>>
    %c1_i32_6 = arith.constant 1 : i32
    %c0_i32_7 = arith.constant 0 : i32
    %12 = tpu.memref_slice %arg8[%c1_i32_6, %c0_i32_7] : memref<8x128xf32, #tpu.memory_space<vmem>> -> memref<1x128xf32, #tpu.memory_space<vmem>>
    %13 = tpu.memref_slice %arg9[%c0_i32_4] : memref<1x!tpu.dma_semaphore, #tpu.memory_space<semaphore_mem>> -> memref<1x!tpu.dma_semaphore, #tpu.memory_space<semaphore_mem>>
    %14 = tpu.memref_squeeze %13 : memref<1x!tpu.dma_semaphore, #tpu.memory_space<semaphore_mem>> -> memref<!tpu.dma_semaphore, #tpu.memory_space<semaphore_mem>>
    tpu.enqueue_dma source(%11 : memref<1x128xf32, #tpu.memory_space<any>>) target(%12 : memref<1x128xf32, #tpu.memory_space<vmem>>) target_semaphore(%14 : memref<!tpu.dma_semaphore, #tpu.memory_space<semaphore_mem>>)
    %c2_i32 = arith.constant 2 : i32
    %15 = arith.addi %0, %c2_i32 : i32
    %16 = arith.index_cast %15 : i32 to index
    %17 = memref.load %arg1[%16] : memref<16xi32, #tpu.memory_space<smem>>
    %c0_i32_8 = arith.constant 0 : i32
    %c0_i32_9 = arith.constant 0 : i32
    %18 = tpu.memref_slice %arg2[%17, %c0_i32_9] : memref<64x128xf32, #tpu.memory_space<any>> -> memref<1x128xf32, #tpu.memory_space<any>>
    %c2_i32_10 = arith.constant 2 : i32
    %c0_i32_11 = arith.constant 0 : i32
    %19 = tpu.memref_slice %arg8[%c2_i32_10, %c0_i32_11] : memref<8x128xf32, #tpu.memory_space<vmem>> -> memref<1x128xf32, #tpu.memory_space<vmem>>
    %20 = tpu.memref_slice %arg9[%c0_i32_8] : memref<1x!tpu.dma_semaphore, #tpu.memory_space<semaphore_mem>> -> memref<1x!tpu.dma_semaphore, #tpu.memory_space<semaphore_mem>>
    %21 = tpu.memref_squeeze %20 : memref<1x!tpu.dma_semaphore, #tpu.memory_space<semaphore_mem>> -> memref<!tpu.dma_semaphore, #tpu.memory_space<semaphore_mem>>
    tpu.enqueue_dma source(%18 : memref<1x128xf32, #tpu.memory_space<any>>) target(%19 : memref<1x128xf32, #tpu.memory_space<vmem>>) target_semaphore(%21 : memref<!tpu.dma_semaphore, #tpu.memory_space<semaphore_mem>>)
    %c3_i32 = arith.constant 3 : i32
    %22 = arith.addi %0, %c3_i32 : i32
    %23 = arith.index_cast %22 : i32 to index
    %24 = memref.load %arg1[%23] : memref<16xi32, #tpu.memory_space<smem>>
    %c0_i32_12 = arith.constant 0 : i32
    %c0_i32_13 = arith.constant 0 : i32
    %25 = tpu.memref_slice %arg2[%24, %c0_i32_13] : memref<64x128xf32, #tpu.memory_space<any>> -> memref<1x128xf32, #tpu.memory_space<any>>
    %c3_i32_14 = arith.constant 3 : i32
    %c0_i32_15 = arith.constant 0 : i32
    %26 = tpu.memref_slice %arg8[%c3_i32_14, %c0_i32_15] : memref<8x128xf32, #tpu.memory_space<vmem>> -> memref<1x128xf32, #tpu.memory_space<vmem>>
    %27 = tpu.memref_slice %arg9[%c0_i32_12] : memref<1x!tpu.dma_semaphore, #tpu.memory_space<semaphore_mem>> -> memref<1x!tpu.dma_semaphore, #tpu.memory_space<semaphore_mem>>
    %28 = tpu.memref_squeeze %27 : memref<1x!tpu.dma_semaphore, #tpu.memory_space<semaphore_mem>> -> memref<!tpu.dma_semaphore, #tpu.memory_space<semaphore_mem>>
    tpu.enqueue_dma source(%25 : memref<1x128xf32, #tpu.memory_space<any>>) target(%26 : memref<1x128xf32, #tpu.memory_space<vmem>>) target_semaphore(%28 : memref<!tpu.dma_semaphore, #tpu.memory_space<semaphore_mem>>)
    %c4_i32 = arith.constant 4 : i32
    %29 = arith.addi %0, %c4_i32 : i32
    %30 = arith.index_cast %29 : i32 to index
    %31 = memref.load %arg1[%30] : memref<16xi32, #tpu.memory_space<smem>>
    %c0_i32_16 = arith.constant 0 : i32
    %c0_i32_17 = arith.constant 0 : i32
    %32 = tpu.memref_slice %arg2[%31, %c0_i32_17] : memref<64x128xf32, #tpu.memory_space<any>> -> memref<1x128xf32, #tpu.memory_space<any>>
    %c4_i32_18 = arith.constant 4 : i32
    %c0_i32_19 = arith.constant 0 : i32
    %33 = tpu.memref_slice %arg8[%c4_i32_18, %c0_i32_19] : memref<8x128xf32, #tpu.memory_space<vmem>> -> memref<1x128xf32, #tpu.memory_space<vmem>>
    %34 = tpu.memref_slice %arg9[%c0_i32_16] : memref<1x!tpu.dma_semaphore, #tpu.memory_space<semaphore_mem>> -> memref<1x!tpu.dma_semaphore, #tpu.memory_space<semaphore_mem>>
    %35 = tpu.memref_squeeze %34 : memref<1x!tpu.dma_semaphore, #tpu.memory_space<semaphore_mem>> -> memref<!tpu.dma_semaphore, #tpu.memory_space<semaphore_mem>>
    tpu.enqueue_dma source(%32 : memref<1x128xf32, #tpu.memory_space<any>>) target(%33 : memref<1x128xf32, #tpu.memory_space<vmem>>) target_semaphore(%35 : memref<!tpu.dma_semaphore, #tpu.memory_space<semaphore_mem>>)
    %c5_i32 = arith.constant 5 : i32
    %36 = arith.addi %0, %c5_i32 : i32
    %37 = arith.index_cast %36 : i32 to index
    %38 = memref.load %arg1[%37] : memref<16xi32, #tpu.memory_space<smem>>
    %c0_i32_20 = arith.constant 0 : i32
    %c0_i32_21 = arith.constant 0 : i32
    %39 = tpu.memref_slice %arg2[%38, %c0_i32_21] : memref<64x128xf32, #tpu.memory_space<any>> -> memref<1x128xf32, #tpu.memory_space<any>>
    %c5_i32_22 = arith.constant 5 : i32
    %c0_i32_23 = arith.constant 0 : i32
    %40 = tpu.memref_slice %arg8[%c5_i32_22, %c0_i32_23] : memref<8x128xf32, #tpu.memory_space<vmem>> -> memref<1x128xf32, #tpu.memory_space<vmem>>
    %41 = tpu.memref_slice %arg9[%c0_i32_20] : memref<1x!tpu.dma_semaphore, #tpu.memory_space<semaphore_mem>> -> memref<1x!tpu.dma_semaphore, #tpu.memory_space<semaphore_mem>>
    %42 = tpu.memref_squeeze %41 : memref<1x!tpu.dma_semaphore, #tpu.memory_space<semaphore_mem>> -> memref<!tpu.dma_semaphore, #tpu.memory_space<semaphore_mem>>
    tpu.enqueue_dma source(%39 : memref<1x128xf32, #tpu.memory_space<any>>) target(%40 : memref<1x128xf32, #tpu.memory_space<vmem>>) target_semaphore(%42 : memref<!tpu.dma_semaphore, #tpu.memory_space<semaphore_mem>>)
    %c6_i32 = arith.constant 6 : i32
    %43 = arith.addi %0, %c6_i32 : i32
    %44 = arith.index_cast %43 : i32 to index
    %45 = memref.load %arg1[%44] : memref<16xi32, #tpu.memory_space<smem>>
    %c0_i32_24 = arith.constant 0 : i32
    %c0_i32_25 = arith.constant 0 : i32
    %46 = tpu.memref_slice %arg2[%45, %c0_i32_25] : memref<64x128xf32, #tpu.memory_space<any>> -> memref<1x128xf32, #tpu.memory_space<any>>
    %c6_i32_26 = arith.constant 6 : i32
    %c0_i32_27 = arith.constant 0 : i32
    %47 = tpu.memref_slice %arg8[%c6_i32_26, %c0_i32_27] : memref<8x128xf32, #tpu.memory_space<vmem>> -> memref<1x128xf32, #tpu.memory_space<vmem>>
    %48 = tpu.memref_slice %arg9[%c0_i32_24] : memref<1x!tpu.dma_semaphore, #tpu.memory_space<semaphore_mem>> -> memref<1x!tpu.dma_semaphore, #tpu.memory_space<semaphore_mem>>
    %49 = tpu.memref_squeeze %48 : memref<1x!tpu.dma_semaphore, #tpu.memory_space<semaphore_mem>> -> memref<!tpu.dma_semaphore, #tpu.memory_space<semaphore_mem>>
    tpu.enqueue_dma source(%46 : memref<1x128xf32, #tpu.memory_space<any>>) target(%47 : memref<1x128xf32, #tpu.memory_space<vmem>>) target_semaphore(%49 : memref<!tpu.dma_semaphore, #tpu.memory_space<semaphore_mem>>)
    %c7_i32 = arith.constant 7 : i32
    %50 = arith.addi %0, %c7_i32 : i32
    %51 = arith.index_cast %50 : i32 to index
    %52 = memref.load %arg1[%51] : memref<16xi32, #tpu.memory_space<smem>>
    %c0_i32_28 = arith.constant 0 : i32
    %c0_i32_29 = arith.constant 0 : i32
    %53 = tpu.memref_slice %arg2[%52, %c0_i32_29] : memref<64x128xf32, #tpu.memory_space<any>> -> memref<1x128xf32, #tpu.memory_space<any>>
    %c7_i32_30 = arith.constant 7 : i32
    %c0_i32_31 = arith.constant 0 : i32
    %54 = tpu.memref_slice %arg8[%c7_i32_30, %c0_i32_31] : memref<8x128xf32, #tpu.memory_space<vmem>> -> memref<1x128xf32, #tpu.memory_space<vmem>>
    %55 = tpu.memref_slice %arg9[%c0_i32_28] : memref<1x!tpu.dma_semaphore, #tpu.memory_space<semaphore_mem>> -> memref<1x!tpu.dma_semaphore, #tpu.memory_space<semaphore_mem>>
    %56 = tpu.memref_squeeze %55 : memref<1x!tpu.dma_semaphore, #tpu.memory_space<semaphore_mem>> -> memref<!tpu.dma_semaphore, #tpu.memory_space<semaphore_mem>>
    tpu.enqueue_dma source(%53 : memref<1x128xf32, #tpu.memory_space<any>>) target(%54 : memref<1x128xf32, #tpu.memory_space<vmem>>) target_semaphore(%56 : memref<!tpu.dma_semaphore, #tpu.memory_space<semaphore_mem>>)
    %c0_i32_32 = arith.constant 0 : i32
    %c0_i32_33 = arith.constant 0 : i32
    %c0_i32_34 = arith.constant 0 : i32
    %57 = tpu.memref_slice %arg2[%c0_i32_33, %c0_i32_34] : memref<64x128xf32, #tpu.memory_space<any>> -> memref<1x128xf32, #tpu.memory_space<any>>
    %c0_i32_35 = arith.constant 0 : i32
    %c0_i32_36 = arith.constant 0 : i32
    %58 = tpu.memref_slice %arg8[%c0_i32_35, %c0_i32_36] : memref<8x128xf32, #tpu.memory_space<vmem>> -> memref<1x128xf32, #tpu.memory_space<vmem>>
    %59 = tpu.memref_slice %arg9[%c0_i32_32] : memref<1x!tpu.dma_semaphore, #tpu.memory_space<semaphore_mem>> -> memref<1x!tpu.dma_semaphore, #tpu.memory_space<semaphore_mem>>
    %60 = tpu.memref_squeeze %59 : memref<1x!tpu.dma_semaphore, #tpu.memory_space<semaphore_mem>> -> memref<!tpu.dma_semaphore, #tpu.memory_space<semaphore_mem>>
    tpu.wait_dma2 semaphore(%60 : memref<!tpu.dma_semaphore, #tpu.memory_space<semaphore_mem>>) src(%57 : memref<1x128xf32, #tpu.memory_space<any>>) dst(%58 : memref<1x128xf32, #tpu.memory_space<vmem>>)
    %c0_i32_37 = arith.constant 0 : i32
    %c0_i32_38 = arith.constant 0 : i32
    %c0_i32_39 = arith.constant 0 : i32
    %61 = tpu.memref_slice %arg2[%c0_i32_38, %c0_i32_39] : memref<64x128xf32, #tpu.memory_space<any>> -> memref<1x128xf32, #tpu.memory_space<any>>
    %c0_i32_40 = arith.constant 0 : i32
    %c0_i32_41 = arith.constant 0 : i32
    %62 = tpu.memref_slice %arg8[%c0_i32_40, %c0_i32_41] : memref<8x128xf32, #tpu.memory_space<vmem>> -> memref<1x128xf32, #tpu.memory_space<vmem>>
    %63 = tpu.memref_slice %arg9[%c0_i32_37] : memref<1x!tpu.dma_semaphore, #tpu.memory_space<semaphore_mem>> -> memref<1x!tpu.dma_semaphore, #tpu.memory_space<semaphore_mem>>
    %64 = tpu.memref_squeeze %63 : memref<1x!tpu.dma_semaphore, #tpu.memory_space<semaphore_mem>> -> memref<!tpu.dma_semaphore, #tpu.memory_space<semaphore_mem>>
    tpu.wait_dma2 semaphore(%64 : memref<!tpu.dma_semaphore, #tpu.memory_space<semaphore_mem>>) src(%61 : memref<1x128xf32, #tpu.memory_space<any>>) dst(%62 : memref<1x128xf32, #tpu.memory_space<vmem>>)
    %c0_i32_42 = arith.constant 0 : i32
    %c0_i32_43 = arith.constant 0 : i32
    %c0_i32_44 = arith.constant 0 : i32
    %65 = tpu.memref_slice %arg2[%c0_i32_43, %c0_i32_44] : memref<64x128xf32, #tpu.memory_space<any>> -> memref<1x128xf32, #tpu.memory_space<any>>
    %c0_i32_45 = arith.constant 0 : i32
    %c0_i32_46 = arith.constant 0 : i32
    %66 = tpu.memref_slice %arg8[%c0_i32_45, %c0_i32_46] : memref<8x128xf32, #tpu.memory_space<vmem>> -> memref<1x128xf32, #tpu.memory_space<vmem>>
    %67 = tpu.memref_slice %arg9[%c0_i32_42] : memref<1x!tpu.dma_semaphore, #tpu.memory_space<semaphore_mem>> -> memref<1x!tpu.dma_semaphore, #tpu.memory_space<semaphore_mem>>
    %68 = tpu.memref_squeeze %67 : memref<1x!tpu.dma_semaphore, #tpu.memory_space<semaphore_mem>> -> memref<!tpu.dma_semaphore, #tpu.memory_space<semaphore_mem>>
    tpu.wait_dma2 semaphore(%68 : memref<!tpu.dma_semaphore, #tpu.memory_space<semaphore_mem>>) src(%65 : memref<1x128xf32, #tpu.memory_space<any>>) dst(%66 : memref<1x128xf32, #tpu.memory_space<vmem>>)
    %c0_i32_47 = arith.constant 0 : i32
    %c0_i32_48 = arith.constant 0 : i32
    %c0_i32_49 = arith.constant 0 : i32
    %69 = tpu.memref_slice %arg2[%c0_i32_48, %c0_i32_49] : memref<64x128xf32, #tpu.memory_space<any>> -> memref<1x128xf32, #tpu.memory_space<any>>
    %c0_i32_50 = arith.constant 0 : i32
    %c0_i32_51 = arith.constant 0 : i32
    %70 = tpu.memref_slice %arg8[%c0_i32_50, %c0_i32_51] : memref<8x128xf32, #tpu.memory_space<vmem>> -> memref<1x128xf32, #tpu.memory_space<vmem>>
    %71 = tpu.memref_slice %arg9[%c0_i32_47] : memref<1x!tpu.dma_semaphore, #tpu.memory_space<semaphore_mem>> -> memref<1x!tpu.dma_semaphore, #tpu.memory_space<semaphore_mem>>
    %72 = tpu.memref_squeeze %71 : memref<1x!tpu.dma_semaphore, #tpu.memory_space<semaphore_mem>> -> memref<!tpu.dma_semaphore, #tpu.memory_space<semaphore_mem>>
    tpu.wait_dma2 semaphore(%72 : memref<!tpu.dma_semaphore, #tpu.memory_space<semaphore_mem>>) src(%69 : memref<1x128xf32, #tpu.memory_space<any>>) dst(%70 : memref<1x128xf32, #tpu.memory_space<vmem>>)
    %c0_i32_52 = arith.constant 0 : i32
    %c0_i32_53 = arith.constant 0 : i32
    %c0_i32_54 = arith.constant 0 : i32
    %73 = tpu.memref_slice %arg2[%c0_i32_53, %c0_i32_54] : memref<64x128xf32, #tpu.memory_space<any>> -> memref<1x128xf32, #tpu.memory_space<any>>
    %c0_i32_55 = arith.constant 0 : i32
    %c0_i32_56 = arith.constant 0 : i32
    %74 = tpu.memref_slice %arg8[%c0_i32_55, %c0_i32_56] : memref<8x128xf32, #tpu.memory_space<vmem>> -> memref<1x128xf32, #tpu.memory_space<vmem>>
    %75 = tpu.memref_slice %arg9[%c0_i32_52] : memref<1x!tpu.dma_semaphore, #tpu.memory_space<semaphore_mem>> -> memref<1x!tpu.dma_semaphore, #tpu.memory_space<semaphore_mem>>
    %76 = tpu.memref_squeeze %75 : memref<1x!tpu.dma_semaphore, #tpu.memory_space<semaphore_mem>> -> memref<!tpu.dma_semaphore, #tpu.memory_space<semaphore_mem>>
    tpu.wait_dma2 semaphore(%76 : memref<!tpu.dma_semaphore, #tpu.memory_space<semaphore_mem>>) src(%73 : memref<1x128xf32, #tpu.memory_space<any>>) dst(%74 : memref<1x128xf32, #tpu.memory_space<vmem>>)
    %c0_i32_57 = arith.constant 0 : i32
    %c0_i32_58 = arith.constant 0 : i32
    %c0_i32_59 = arith.constant 0 : i32
    %77 = tpu.memref_slice %arg2[%c0_i32_58, %c0_i32_59] : memref<64x128xf32, #tpu.memory_space<any>> -> memref<1x128xf32, #tpu.memory_space<any>>
    %c0_i32_60 = arith.constant 0 : i32
    %c0_i32_61 = arith.constant 0 : i32
    %78 = tpu.memref_slice %arg8[%c0_i32_60, %c0_i32_61] : memref<8x128xf32, #tpu.memory_space<vmem>> -> memref<1x128xf32, #tpu.memory_space<vmem>>
    %79 = tpu.memref_slice %arg9[%c0_i32_57] : memref<1x!tpu.dma_semaphore, #tpu.memory_space<semaphore_mem>> -> memref<1x!tpu.dma_semaphore, #tpu.memory_space<semaphore_mem>>
    %80 = tpu.memref_squeeze %79 : memref<1x!tpu.dma_semaphore, #tpu.memory_space<semaphore_mem>> -> memref<!tpu.dma_semaphore, #tpu.memory_space<semaphore_mem>>
    tpu.wait_dma2 semaphore(%80 : memref<!tpu.dma_semaphore, #tpu.memory_space<semaphore_mem>>) src(%77 : memref<1x128xf32, #tpu.memory_space<any>>) dst(%78 : memref<1x128xf32, #tpu.memory_space<vmem>>)
    %c0_i32_62 = arith.constant 0 : i32
    %c0_i32_63 = arith.constant 0 : i32
    %c0_i32_64 = arith.constant 0 : i32
    %81 = tpu.memref_slice %arg2[%c0_i32_63, %c0_i32_64] : memref<64x128xf32, #tpu.memory_space<any>> -> memref<1x128xf32, #tpu.memory_space<any>>
    %c0_i32_65 = arith.constant 0 : i32
    %c0_i32_66 = arith.constant 0 : i32
    %82 = tpu.memref_slice %arg8[%c0_i32_65, %c0_i32_66] : memref<8x128xf32, #tpu.memory_space<vmem>> -> memref<1x128xf32, #tpu.memory_space<vmem>>
    %83 = tpu.memref_slice %arg9[%c0_i32_62] : memref<1x!tpu.dma_semaphore, #tpu.memory_space<semaphore_mem>> -> memref<1x!tpu.dma_semaphore, #tpu.memory_space<semaphore_mem>>
    %84 = tpu.memref_squeeze %83 : memref<1x!tpu.dma_semaphore, #tpu.memory_space<semaphore_mem>> -> memref<!tpu.dma_semaphore, #tpu.memory_space<semaphore_mem>>
    tpu.wait_dma2 semaphore(%84 : memref<!tpu.dma_semaphore, #tpu.memory_space<semaphore_mem>>) src(%81 : memref<1x128xf32, #tpu.memory_space<any>>) dst(%82 : memref<1x128xf32, #tpu.memory_space<vmem>>)
    %c0_i32_67 = arith.constant 0 : i32
    %c0_i32_68 = arith.constant 0 : i32
    %c0_i32_69 = arith.constant 0 : i32
    %85 = tpu.memref_slice %arg2[%c0_i32_68, %c0_i32_69] : memref<64x128xf32, #tpu.memory_space<any>> -> memref<1x128xf32, #tpu.memory_space<any>>
    %c0_i32_70 = arith.constant 0 : i32
    %c0_i32_71 = arith.constant 0 : i32
    %86 = tpu.memref_slice %arg8[%c0_i32_70, %c0_i32_71] : memref<8x128xf32, #tpu.memory_space<vmem>> -> memref<1x128xf32, #tpu.memory_space<vmem>>
    %87 = tpu.memref_slice %arg9[%c0_i32_67] : memref<1x!tpu.dma_semaphore, #tpu.memory_space<semaphore_mem>> -> memref<1x!tpu.dma_semaphore, #tpu.memory_space<semaphore_mem>>
    %88 = tpu.memref_squeeze %87 : memref<1x!tpu.dma_semaphore, #tpu.memory_space<semaphore_mem>> -> memref<!tpu.dma_semaphore, #tpu.memory_space<semaphore_mem>>
    tpu.wait_dma2 semaphore(%88 : memref<!tpu.dma_semaphore, #tpu.memory_space<semaphore_mem>>) src(%85 : memref<1x128xf32, #tpu.memory_space<any>>) dst(%86 : memref<1x128xf32, #tpu.memory_space<vmem>>)
    %c0 = arith.constant 0 : index
    %c0_72 = arith.constant 0 : index
    %89 = vector.load %arg8[%c0, %c0_72] : memref<8x128xf32, #tpu.memory_space<vmem>>, vector<8x128xf32>
    %90 = arith.mulf %89, %89 : vector<8x128xf32>
    %cst = arith.constant dense<0.000000e+00> : vector<8xf32>
    %91 = vector.multi_reduction <add>, %90, %cst [1] : vector<8x128xf32> to vector<8xf32>
    %92 = vector.shape_cast %91 : vector<8xf32> to vector<8x1xf32>
    %cst_73 = arith.constant 1.000000e-24 : f32
    %93 = vector.broadcast %cst_73 : f32 to vector<8x1xf32>
    %94 = arith.maximumf %92, %93 : vector<8x1xf32>
    %95 = math.rsqrt %94 : vector<8x1xf32>
    %96 = vector.broadcast %95 : vector<8x1xf32> to vector<8x128xf32>
    %97 = arith.mulf %89, %96 : vector<8x128xf32>
    %c0_74 = arith.constant 0 : index
    %c0_75 = arith.constant 0 : index
    %c0_76 = arith.constant 0 : index
    %98 = vector.load %arg3[%c0_74, %c0_75, %c0_76] : memref<1x8x16xbf16, #tpu.memory_space<vmem>>, vector<1x8x16xbf16>
    %99 = vector.extract_strided_slice %98 {offsets = [0, 0, 0], sizes = [1, 8, 8], strides = [1, 1, 1]} : vector<1x8x16xbf16> to vector<1x8x8xbf16>
    %100 = vector.extract_strided_slice %98 {offsets = [0, 0, 8], sizes = [1, 8, 8], strides = [1, 1, 1]} : vector<1x8x16xbf16> to vector<1x8x8xbf16>
    %c0_77 = arith.constant 0 : index
    %c0_78 = arith.constant 0 : index
    %101 = vector.load %arg4[%c0_77, %c0_78] : memref<128x1152xbf16, #tpu.memory_space<vmem>>, vector<128x1152xbf16>
    %c0_79 = arith.constant 0 : index
    %c0_80 = arith.constant 0 : index
    %102 = vector.load %arg5[%c0_79, %c0_80] : memref<1x1152xf32, #tpu.memory_space<vmem>>, vector<1x1152xf32>
    %c0_81 = arith.constant 0 : index
    %c0_82 = arith.constant 0 : index
    %103 = vector.load %arg6[%c0_81, %c0_82] : memref<1x384xf32, #tpu.memory_space<vmem>>, vector<1x384xf32>
    %104 = arith.truncf %97 : vector<8x128xf32> to vector<8x128xbf16>
    %cst_83 = arith.constant dense<0.000000e+00> : vector<8x1152xf32>
    %105 = tpu.matmul %104, %101, %cst_83 {dimension_numbers = #tpu.dot_dimension_numbers<[1], [0], [0], [1], [0, 0, 1, 1], [], []>} : vector<8x128xbf16>, vector<128x1152xbf16>, vector<8x1152xf32> -> vector<8x1152xf32>
    %106 = vector.broadcast %102 : vector<1x1152xf32> to vector<8x1152xf32>
    %107 = arith.addf %105, %106 : vector<8x1152xf32>
    %108 = vector.extract_strided_slice %107 {offsets = [0, 0], sizes = [8, 384], strides = [1, 1]} : vector<8x1152xf32> to vector<8x384xf32>
    %109 = vector.shape_cast %108 : vector<8x384xf32> to vector<1x8x384xf32>
    %110 = arith.truncf %109 : vector<1x8x384xf32> to vector<1x8x384xbf16>
    %111 = vector.extract_strided_slice %107 {offsets = [0, 384], sizes = [8, 384], strides = [1, 1]} : vector<8x1152xf32> to vector<8x384xf32>
    %112 = vector.shape_cast %111 : vector<8x384xf32> to vector<1x8x384xf32>
    %113 = arith.truncf %112 : vector<1x8x384xf32> to vector<1x8x384xbf16>
    %114 = vector.extract_strided_slice %107 {offsets = [0, 768], sizes = [8, 384], strides = [1, 1]} : vector<8x1152xf32> to vector<8x384xf32>
    "tpu.trace_start"() <{level = 10 : i32, message = "bij,bjg->big"}> : () -> ()
    %cst_84 = arith.constant dense<0.000000e+00> : vector<1x8x384xf32>
    %115 = tpu.matmul %99, %110, %cst_84 {dimension_numbers = #tpu.dot_dimension_numbers<[2], [1], [1], [2], [0, 0, 0, 1, 1, 2], [0], [0]>} : vector<1x8x8xbf16>, vector<1x8x384xbf16>, vector<1x8x384xf32> -> vector<1x8x384xf32>
    %cst_85 = arith.constant dense<0.000000e+00> : vector<1x8x384xf32>
    %116 = tpu.matmul %100, %113, %cst_85 {dimension_numbers = #tpu.dot_dimension_numbers<[2], [1], [1], [2], [0, 0, 0, 1, 1, 2], [0], [0]>} : vector<1x8x8xbf16>, vector<1x8x384xbf16>, vector<1x8x384xf32> -> vector<1x8x384xf32>
    "tpu.trace_stop"() : () -> ()
    %117 = arith.addf %115, %116 : vector<1x8x384xf32>
    %118 = vector.shape_cast %117 : vector<1x8x384xf32> to vector<8x384xf32>
    %119 = vector.broadcast %103 : vector<1x384xf32> to vector<8x384xf32>
    %120 = arith.addf %118, %119 : vector<8x384xf32>
    %121 = vector.extract_strided_slice %120 {offsets = [0, 0], sizes = [8, 128], strides = [1, 1]} : vector<8x384xf32> to vector<8x128xf32>
    %122 = vector.extract_strided_slice %120 {offsets = [0, 128], sizes = [8, 128], strides = [1, 1]} : vector<8x384xf32> to vector<8x128xf32>
    %123 = vector.extract_strided_slice %120 {offsets = [0, 256], sizes = [8, 128], strides = [1, 1]} : vector<8x384xf32> to vector<8x128xf32>
    %124 = vector.extract_strided_slice %114 {offsets = [0, 0], sizes = [8, 128], strides = [1, 1]} : vector<8x384xf32> to vector<8x128xf32>
    %125 = vector.extract_strided_slice %114 {offsets = [0, 128], sizes = [8, 128], strides = [1, 1]} : vector<8x384xf32> to vector<8x128xf32>
    %126 = vector.extract_strided_slice %114 {offsets = [0, 256], sizes = [8, 128], strides = [1, 1]} : vector<8x384xf32> to vector<8x128xf32>
    %127 = arith.addf %121, %124 : vector<8x128xf32>
    %128 = arith.negf %127 : vector<8x128xf32>
    %129 = math.exp %128 : vector<8x128xf32>
    %cst_86 = arith.constant 1.000000e+00 : f32
    %130 = vector.broadcast %cst_86 : f32 to vector<8x128xf32>
    %131 = arith.addf %130, %129 : vector<8x128xf32>
    %132 = arith.divf %130, %131 : vector<8x128xf32>
    %133 = arith.addf %122, %125 : vector<8x128xf32>
    %134 = arith.negf %133 : vector<8x128xf32>
    %135 = math.exp %134 : vector<8x128xf32>
    %cst_87 = arith.constant 1.000000e+00 : f32
    %136 = vector.broadcast %cst_87 : f32 to vector<8x128xf32>
    %137 = arith.addf %136, %135 : vector<8x128xf32>
    %138 = arith.divf %136, %137 : vector<8x128xf32>
    %139 = arith.mulf %132, %126 : vector<8x128xf32>
    %140 = arith.addf %123, %139 : vector<8x128xf32>
    %141 = math.tanh %140 : vector<8x128xf32>
    %142 = arith.subf %97, %141 : vector<8x128xf32>
    %143 = arith.mulf %138, %142 : vector<8x128xf32>
    %144 = arith.addf %141, %143 : vector<8x128xf32>
    %c0_88 = arith.constant 0 : index
    %c0_89 = arith.constant 0 : index
    %145 = vector.load %arg7[%c0_88, %c0_89] : memref<8x128xf32, #tpu.memory_space<vmem>>, vector<8x128xf32>
    tpu.vector_store %arg7[%c0_88, %c0_89], %144 {strides = array<i32>} : memref<8x128xf32, #tpu.memory_space<vmem>>, vector<8x128xf32>,
    return
  }
  func.func @transform_1(%arg0: i32, %arg1: memref<16xi32, #tpu.memory_space<smem>>) -> (i32, i32, i32) {
    %c0_i32 = arith.constant 0 : i32
    %c0_i32_0 = arith.constant 0 : i32
    %c0_i32_1 = arith.constant 0 : i32
    return %arg0, %c0_i32, %c0_i32_0 : i32, i32, i32
  }
  func.func @transform_2(%arg0: i32, %arg1: memref<16xi32, #tpu.memory_space<smem>>) -> (i32, i32) {
    %c0_i32 = arith.constant 0 : i32
    %c0_i32_0 = arith.constant 0 : i32
    %c0_i32_1 = arith.constant 0 : i32
    return %c0_i32, %c0_i32_0 : i32, i32
  }
  func.func @transform_3(%arg0: i32, %arg1: memref<16xi32, #tpu.memory_space<smem>>) -> (i32, i32) {
    %c0_i32 = arith.constant 0 : i32
    %c0_i32_0 = arith.constant 0 : i32
    %c0_i32_1 = arith.constant 0 : i32
    return %c0_i32, %c0_i32_0 : i32, i32
  }
  func.func @transform_4(%arg0: i32, %arg1: memref<16xi32, #tpu.memory_space<smem>>) -> (i32, i32) {
    %c0_i32 = arith.constant 0 : i32
    %c0_i32_0 = arith.constant 0 : i32
    %c0_i32_1 = arith.constant 0 : i32
    return %c0_i32, %c0_i32_0 : i32, i32
  }
  func.func @transform_5(%arg0: i32, %arg1: memref<16xi32, #tpu.memory_space<smem>>) -> (i32, i32) {
    %c0_i32 = arith.constant 0 : i32
    %c0_i32_0 = arith.constant 0 : i32
    return %arg0, %c0_i32 : i32, i32
  }
}

</mosaic_0001>

<bundles_post_ra>
// kernel: tpu_custom_call.1
= control target key start
LH: loop header
LB: loop body
LE: loop exit
PB: predicated region body
PF: predicated region fallthrough
CT: control target
= control target key end

     0   :  { %s2622_s0 = inlined_call_operand.hbm [shape: s32[16], index: 0, kind: input, shape index: {}]   ;;  %s2623_s1 = inlined_call_operand.hbm [shape: f32[64,128], index: 1, kind: input, shape index: {}]   ;;  %s2624_s2 = inlined_call_operand.hbm [shape: bf16[2,8,16], index: 2, kind: input, shape index: {}]   ;;  %s2625_s3 = inlined_call_operand.hbm [shape: bf16[128,1152], index: 3, kind: input, shape index: {}]   ;;  %s2626_s4 = inlined_call_operand.vmem [shape: f32[1,1152], index: 4, kind: input, shape index: {}]   ;;  %s2627_s5 = inlined_call_operand.vmem [shape: f32[1,384], index: 5, kind: input, shape index: {}]   ;;  %s2628_s6 = inlined_call_operand.hbm [shape: f32[16,128], index: 6, kind: output, shape index: {}]  }
   0x1   :  { %2637 = sst [smem:[#allocation40_spill]] %s2624_s2  ;;  %s1797_s23 = scalar_lea.hbm %s2622_s0, 16 }
   0x2   :  { %2638 = sst [smem:[#allocation41_spill]] %s2625_s3  ;;  %p1798_p0 = scmp.ne.s32.totalorder %s2622_s0, %s1797_s23 }
   0x3   :  { %p1801_p1 = scmp.lt.u32.totalorder %s1797_s23, %s2622_s0 }
   0x5   :  { %p1803_p2 = pnand %p1801_p1, %p1798_p0 }
   0x7   :  { %1806 = shalt.err (!%p1803_p2)  }
   0x8   :  { %s2133_s28 = smov [#allocation5]  }
   0x9   :  { %12 = dma.hbm_to_smem %s2622_s0, 16, %s2133_s28, [#allocation4] }
   0xa   :  { %2101 = dma.done.wait [#allocation4], 16 }
   0xb   :  { %2102 = vsyncadd [#allocation4], 4294967280 }
   0xc   :  { %14 = sfence }
   0xd   :  { %15 = vsyncpa [#allocation7], 0 }
   0xe   :  { %17 = vsyncpa [#allocation7 + $0x1], 0 }
   0xf   :  { %18 = vsyncpa [#allocation10], 0 }
  0x10   :  { %19 = vsyncpa [#allocation8], 0 }
  0x11   :  { %21 = vsyncpa [#allocation8 + $0x1], 0  ;;  %s2198_s7 = smov 0   ;;  %s2200_s8 = smov 0  }
  0x12   :  { %s2202_s9 = smov 0   ;;  %s2204_s10 = smov 0  }
  0x13 LB: > { %2639 = sst [smem:[#allocation35_spill]] %s2123_s8  ;;  %s2219_s0 = sadd.s32 4294967295, %s2131_s10   ;;  %s2131_s10 = sphi %s2204_s10, %s2661_s10   ;;  %s2127_s9 = sphi %s2202_s9, %s2664_s9   ;;  %s2123_s8 = sphi %s2200_s8, %s2663_s8   ;;  %s2119_s7 = sphi %s2198_s7, %s2662_s7  }
  0x14   : > { %2640 = sst [smem:[#allocation36_spill]] %s2127_s9  ;;  %s1445_s11 = sadd.s32 4294967294, %s2131_s10  }
  0x15   : > { %2641 = sst [smem:[#allocation37_spill]] %s2131_s10  ;;  %p47_p3 = scmp.ne.s32.totalorder %s2123_s8, %s2119_s7 }
  0x16   : > { %p2629_p4 = scmp.eq.s32.totalorder %s2219_s0, 0  ;;  %p140_p6 = scmp.eq.s32.totalorder %s1445_s11, 1 }
  0x17   : > { %p1446_p8 = scmp.ge.s32.totalorder %s2131_s10, 1  ;;  %p147_p10 = scmp.lt.s32.totalorder %s2131_s10, 3 }
  0x18   : > { %p2228_p7 = por %p2629_p4, %p47_p3  ;;  %p2233_p9 = por %p140_p6, %p47_p3 }
  0x19   : > { %p2238_p11 = pnand %p1446_p8, %p147_p10  ;;  %s2134_s15 = smov [#allocation9]  }
  0x1a   : > { %s2642_s12 = scalar_select %p2228_p7, 1, 0 }
  0x1b   : > { %s2643_s13 = scalar_select %p2233_p9, 1, 0 }
  0x1c   : > { %s2644_s14 = scalar_select %p2238_p11, 1, 0 }
  0x1d   : > { %s159_s16 = sshll.u32 %s2134_s15, 4  ;;  %p1616_p12 = pneg %p2238_p11  ;;  %s2242_s16 = int_to_ptr.vmem [resolvable:$true] %s159_s16 }
  0x1e   : > { %s2254_s18 = sadd.s32 1, %s2131_s10   ;;  %s34_s19 = sadd.s32 1, %s2127_s9 }
  0x1f   : > { %p2249_p0 = pnand %p1616_p12, %p2629_p4  ;;  %2646 = sst [smem:[#allocation38_spill]] %s2254_s18 }
  0x20   : > { %s31_s20 = ssub.s32 %s2131_s10, %s2254_s18  ;;  %s2647_s3 = sld [smem:[#allocation41_spill]] }
  0x21   : > { %p1809_p2 = pneg %p2249_p0 }
  0x26   : > { %s1807_s23 = scalar_lea.hbm %s2647_s3, 9216 }
  0x27   : > { %p1808_p1 = scmp.ne.s32.totalorder %s2647_s3, %s1807_s23  ;;  %p1814_p8 = scmp.lt.u32.totalorder %s1807_s23, %s2647_s3 }
  0x29   : > { %p1810_p3 = pnand %p1809_p2, %p1808_p1 }
  0x2b   : > { %p1811_p6 = pneg %p1810_p3 }
  0x2d   : > { %p1816_p10 = pnand %p1814_p8, %p1811_p6 }
  0x2f   : > { %1819 = shalt.err (!%p1816_p10)
}
  0x30   : > { %s1820_s28 = scalar_lea.vmem %s2242_s16, 9216  ;;  %p1828_p5 = scmp.lt.s32.totalorder %s2242_s16, %s2242_s16 }
  0x31   : > { %p1821_p12 = scmp.ne.s32.totalorder %s2242_s16, %s1820_s28  ;;  %p1829_p9 = scmp.lt.s32.totalorder %s1820_s28, %s1820_s28 }
  0x33   : > { %p1823_p13 = pnand %p1821_p12, %p1809_p2  ;;  %p1830_p7 = por %p1829_p9, %p1828_p5 }
  0x35   : > { %p1824_p4 = pneg %p1823_p13 }
  0x37   : > { %p1831_p11 = pnand %p1830_p7, %p1824_p4 }
  0x39   : > { %1834 = shalt.err (!%p1831_p11)
}
  0x3a   : > { %s2135_s29 = smov 576   ;;  %s2136_s30 = smov 36  }
  0x3b   : > { %1619 = dma.hbm_to_vmem [thread:$0]  (!%p2249_p0), %s2647_s3, 9216, %s2242_s16, [#allocation10], %s2135_s29, %s2135_s29, %s2136_s30  }
  0x3c   : > { %p32_p5 = scmp.eq.s32.totalorder %s31_s20, 0  ;;  %p41_p4 = scmp.ne.s32.totalorder %s2127_s9, %s2123_s8 }
  0x3d   : > { %p42_p7 = scmp.eq.s32.totalorder %s2131_s10, 0  ;;  %p1629_p9 = scmp.lt.s32.totalorder %s2131_s10, 2 }
  0x3e   : > { %s2285_s21 = scalar_select %p32_p5, %s2127_s9, %s34_s19  }
  0x3f   : > { %p43_p11 = por %p42_p7, %p41_p4  ;;  %p2649_p13 = scmp.eq.s32.totalorder %s2219_s0, 1 }
  0x40   : > { %2648 = sst [smem:[#allocation39_spill]] %s2285_s21  ;;  %s179_s23 = sand.u32 1, %s2127_s9  }
  0x41   : > { %p2289_p1 = por %p2649_p13, %p41_p4  ;;  %s1450_s24 = sshll.u32 %s2131_s10, 6 }
  0x42   : > { %s1449_s25 = sshll.u32 %s179_s23, 2  ;;  %s2651_s2 = sld [smem:[#allocation40_spill]] }
  0x43   : > { %s183_s16 = scalar_lea.vmem [#allocation6], %s1449_s25  ;;  %p2300_p0 = pnand %p1629_p9, %p43_p11 }
  0x44   : > { %s190_s19 = sshll.u32 %s183_s16, 4  ;;  %s180_s28 = scalar_lea.sflag [#allocation7], %s179_s23  ;;  %s2304_s19 = int_to_ptr.vmem [resolvable:$true] %s190_s19 }
  0x45   : > { %p1837_p3 = pneg %p2300_p0 }
  0x48   : > { %s2298_s27 = scalar_lea.hbm %s2651_s2, %s1450_s24  ;;  %s1840_s15 = scalar_lea.hbm %s2651_s2, 128 }
  0x49   : > { %s1835_s29 = scalar_lea.hbm %s2298_s27, 64  ;;  %p1841_p10 = scmp.lt.u32.totalorder %s2298_s27, %s2651_s2 }
  0x4a   : > { %p1836_p2 = scmp.ne.s32.totalorder %s2298_s27, %s1835_s29  ;;  %p1842_p12 = scmp.lt.u32.totalorder %s1840_s15, %s1835_s29 }
  0x4b   : > { %p1844_p4 = scmp.lt.u32.totalorder %s1835_s29, %s2298_s27 }
  0x4c   : > { %p1838_p6 = pnand %p1837_p3, %p1836_p2  ;;  %p1843_p5 = por %p1842_p12, %p1841_p10 }
  0x4e   : > { %p1839_p8 = pneg %p1838_p6  ;;  %p1845_p7 = por %p1844_p4, %p1843_p5 }
  0x50   : > { %p1846_p9 = pnand %p1845_p7, %p1839_p8 }
  0x52   : > { %1849 = shalt.err (!%p1846_p9)
}
  0x53   : > { %s1850_s23 = scalar_lea.vmem %s2304_s19, 64  ;;  %s2137_s17 = smov [#allocation6]  }
  0x54   : > { %p1851_p11 = scmp.ne.s32.totalorder %s2304_s19, %s1850_s23  ;;  %s1855_s26 = sshll.u32 %s2137_s17, 4  ;;  %s1856_s26 = int_to_ptr.vmem [resolvable:$false] %s1855_s26 }
  0x55   : > { %s1857_s16 = scalar_lea.vmem %s1856_s26, 128  ;;  %p1858_p6 = scmp.lt.s32.totalorder %s2304_s19, %s1856_s26 }
  0x56   : > { %p1853_p13 = pnand %p1851_p11, %p1837_p3  ;;  %p1859_p10 = scmp.lt.s32.totalorder %s1857_s16, %s1850_s23 }
  0x58   : > { %p1854_p2 = pneg %p1853_p13  ;;  %p1860_p12 = por %p1859_p10, %p1858_p6 }
  0x5a   : > { %p1861_p5 = pnand %p1860_p12, %p1854_p2 }
  0x5c   : > { %1864 = shalt.err (!%p1861_p5)
}
  0x5d   : > { %1623 = dma.hbm_to_vmem [thread:$0]  (!%p2300_p0), %s2298_s27, 64, %s2304_s19, %s180_s28  }
  0x5e   : > { %p2653_p8 = scmp.ne.s32.totalorder %s2644_s14, 0 }
  0x5f   : > { %s2334_s29 = sand.u32 (!%p2653_p8), 1, %s2123_s8   ;;  %p2654_p3 = scmp.ne.s32.totalorder (!%p2653_p8), %s2642_s12, 0 }
  0x60   : > { %199 = sbr.rel (%p2653_p8) target bundleno = 1000 (0x3e8), region = 36  ;;  %s1452_s30 = sshll.u32 (!%p2653_p8), %s2334_s29, 2 }
  0x61   : > { %s202_s11 = scalar_lea.sflag (!%p2653_p8), [#allocation7], %s2334_s29  ;;  %s2338_s15 = scalar_lea.vmem (!%p2653_p8), [#allocation6], %s1452_s30 }
  0x67   : > { %2104 = dma.done.wait (%p2654_p3), %s202_s11, 64  }
  0x68   : > { %2106 = vsyncadd (%p2654_p3), %s202_s11, 4294967232  ;;  %p2655_p0 = scmp.eq.s32.totalorder %s2219_s0, 0 }
  0x6a   : > { %2108 = dma.done.wait (%p2655_p0), [#allocation10], 9216   ;;  %p2656_p4 = pmov %p2655_p0 }
  0x6b   : > { %s2350_s27 = sshll.u32 %s2219_s0, 3  ;;  %s2138_s28 = smov [#allocation2]  }
  0x6c   : > { %2110 = vsyncadd (%p2656_p4), [#allocation10], 4294958080  ;;  %s236_s19 = sld [smem:[#allocation5 + %s2350_s27]]  ;;  %s250_s20 = sadd.s32 1, %s2350_s27 }
  0x6d   : > { %s246_s24 = sshll.u32 %s2138_s28, 4  ;;  %s2354_s12 = sld [smem:[#allocation5 + %s250_s20]]  ;;  %s2356_s24 = int_to_ptr.vmem [resolvable:$true] %s246_s24 }
  0x6e   : > { %s2139_s25 = smov [#allocation2 + $0x1]   ;;  %s266_s17 = sadd.s32 2, %s2350_s27 }
  0x6f   : > { %s262_s23 = sshll.u32 %s2139_s25, 4  ;;  %s2361_s26 = sld [smem:[#allocation5 + %s266_s17]]  ;;  %s2359_s23 = int_to_ptr.vmem [resolvable:$true] %s262_s23 }
  0x70   : > { %s2140_s2 = smov [#allocation2 + $0x2]   ;;  %s2369_s9 = scalar_lea.hbm %s2623_s1, 1024 }
  0x71   : > { %s278_s3 = sshll.u32 %s2140_s2, 4  ;;  %s2385_s3 = int_to_ptr.vmem [resolvable:$true] %s278_s3 }
  0x72   : > { %s1456_s16 = sshll.u32 %s236_s19, 4 }
  0x73   : > { %s238_s14 = scalar_lea.hbm %s2623_s1, %s1456_s16 }
  0x74   : > { %s1865_s21 = scalar_lea.hbm %s238_s14, 16  ;;  %p1868_p9 = scmp.lt.u32.totalorder %s238_s14, %s2623_s1 }
  0x75   : > { %p1866_p7 = scmp.ne.s32.totalorder %s238_s14, %s1865_s21  ;;  %p1869_p11 = scmp.lt.u32.totalorder %s2369_s9, %s1865_s21 }
  0x76   : > { %p1871_p2 = scmp.lt.u32.totalorder %s1865_s21, %s238_s14 }
  0x77   : > { %p1870_p13 = por %p1869_p11, %p1868_p9 }
  0x79   : > { %p1872_p6 = por %p1871_p2, %p1870_p13 }
  0x7b   : > { %p1873_p10 = pnand %p1872_p6, %p1866_p7 }
  0x7d   : > { %1876 = shalt.err (!%p1873_p10)  }
  0x7e   : > { %s1877_s2 = scalar_lea.vmem %s2356_s24, 16  ;;  %s2378_s19 = scalar_lea.vmem %s2356_s24, 128 }
  0x7f   : > { %p1878_p12 = scmp.ne.s32.totalorder %s2356_s24, %s1877_s2  ;;  %p1882_p5 = scmp.lt.s32.totalorder %s2356_s24, %s2356_s24 }
  0x80   : > { %p1883_p8 = scmp.lt.s32.totalorder %s2378_s19, %s1877_s2 }
  0x82   : > { %p1884_p3 = por %p1883_p8, %p1882_p5 }
  0x84   : > { %p1885_p0 = pnand %p1884_p3, %p1878_p12 }
  0x86   : > { %1888 = shalt.err (!%p1885_p0)  }
  0x87   : > { %249 = dma.hbm_to_vmem [thread:$0]  %s238_s14, 16, %s2356_s24, [#allocation3] }
  0x88   : > { %s1457_s8 = sshll.u32 %s2354_s12, 4  ;;  %s282_s30 = sadd.s32 3, %s2350_s27 }
  0x89   : > { %s253_s16 = scalar_lea.hbm %s2623_s1, %s1457_s8 }
  0x8a   : > { %s1889_s11 = scalar_lea.hbm %s253_s16, 16  ;;  %p1892_p7 = scmp.lt.u32.totalorder %s253_s16, %s2623_s1 }
  0x8b   : > { %p1890_p4 = scmp.ne.s32.totalorder %s253_s16, %s1889_s11  ;;  %p1893_p9 = scmp.lt.u32.totalorder %s2369_s9, %s1889_s11 }
  0x8c   : > { %p1895_p13 = scmp.lt.u32.totalorder %s1889_s11, %s253_s16 }
  0x8d   : > { %p1894_p11 = por %p1893_p9, %p1892_p7 }
  0x8f   : > { %p1896_p2 = por %p1895_p13, %p1894_p11 }
  0x91   : > { %p1897_p6 = pnand %p1896_p2, %p1890_p4 }
  0x93   : > { %1900 = shalt.err (!%p1897_p6)  }
  0x94   : > { %s1901_s14 = scalar_lea.vmem %s2359_s23, 16  ;;  %p1906_p12 = scmp.lt.s32.totalorder %s2359_s23, %s2356_s24 }
  0x95   : > { %p1902_p10 = scmp.ne.s32.totalorder %s2359_s23, %s1901_s14  ;;  %p1907_p5 = scmp.lt.s32.totalorder %s2378_s19, %s1901_s14 }
  0x97   : > { %p1908_p8 = por %p1907_p5, %p1906_p12 }
  0x99   : > { %p1909_p3 = pnand %p1908_p8, %p1902_p10 }
  0x9b   : > { %1912 = shalt.err (!%p1909_p3)  }
  0x9c   : > { %265 = dma.hbm_to_vmem [thread:$0]  %s253_s16, 16, %s2359_s23, [#allocation3] }
  0x9d   : > { %s1458_s12 = sshll.u32 %s2361_s26, 4  ;;  %s2402_s25 = sld [smem:[#allocation5 + %s282_s30]] }
  0x9e   : > { %s269_s21 = scalar_lea.hbm %s2623_s1, %s1458_s12 }
  0x9f   : > { %s1913_s17 = scalar_lea.hbm %s269_s21, 16  ;;  %p1916_p4 = scmp.lt.u32.totalorder %s269_s21, %s2623_s1 }
  0xa0   : > { %p1914_p0 = scmp.ne.s32.totalorder %s269_s21, %s1913_s17  ;;  %p1917_p7 = scmp.lt.u32.totalorder %s2369_s9, %s1913_s17 }
  0xa1   : > { %p1919_p11 = scmp.lt.u32.totalorder %s1913_s17, %s269_s21 }
  0xa2   : > { %p1918_p9 = por %p1917_p7, %p1916_p4 }
  0xa4   : > { %p1920_p13 = por %p1919_p11, %p1918_p9 }
  0xa6   : > { %p1921_p2 = pnand %p1920_p13, %p1914_p0 }
  0xa8   : > { %1924 = shalt.err (!%p1921_p2)  }
  0xa9   : > { %s1925_s23 = scalar_lea.vmem %s2385_s3, 16  ;;  %p1930_p10 = scmp.lt.s32.totalorder %s2385_s3, %s2356_s24 }
  0xaa   : > { %p1926_p6 = scmp.ne.s32.totalorder %s2385_s3, %s1925_s23  ;;  %p1931_p12 = scmp.lt.s32.totalorder %s2378_s19, %s1925_s23 }
  0xac   : > { %p1932_p5 = por %p1931_p12, %p1930_p10 }
  0xae   : > { %p1933_p8 = pnand %p1932_p5, %p1926_p6 }
  0xb0   : > { %1936 = shalt.err (!%p1933_p8)  }
  0xb1   : > { %281 = dma.hbm_to_vmem [thread:$0]  %s269_s21, 16, %s2385_s3, [#allocation3] }
  0xb2   : > { %s2141_s26 = smov [#allocation2 + $0x3]   ;;  %s298_s30 = sadd.s32 4, %s2350_s27 }
  0xb3   : > { %s294_s16 = sshll.u32 %s2141_s26, 4  ;;  %s299_s28 = sld [smem:[#allocation5 + %s298_s30]]  ;;  %s295_s16 = int_to_ptr.vmem [resolvable:$true] %s294_s16 }
  0xb4   : > { %s314_s14 = sadd.s32 5, %s2350_s27  ;;  %s1459_s12 = sshll.u32 %s2402_s25, 4 }
  0xb5   : > { %s2142_s2 = smov [#allocation2 + $0x4]   ;;  %s285_s20 = scalar_lea.hbm %s2623_s1, %s1459_s12 }
  0xb6   : > { %s310_s8 = sshll.u32 %s2142_s2, 4  ;;  %s1937_s23 = scalar_lea.hbm %s285_s20, 16  ;;  %s2423_s8 = int_to_ptr.vmem [resolvable:$true] %s310_s8 }
  0xb7   : > { %p1938_p3 = scmp.ne.s32.totalorder %s285_s20, %s1937_s23  ;;  %p1940_p0 = scmp.lt.u32.totalorder %s285_s20, %s2623_s1 }
  0xb8   : > { %p1941_p4 = scmp.lt.u32.totalorder %s2369_s9, %s1937_s23  ;;  %p1943_p9 = scmp.lt.u32.totalorder %s1937_s23, %s285_s20 }
  0xba   : > { %p1942_p7 = por %p1941_p4, %p1940_p0 }
  0xbc   : > { %p1944_p11 = por %p1943_p9, %p1942_p7 }
  0xbe   : > { %p1945_p13 = pnand %p1944_p11, %p1938_p3 }
  0xc0   : > { %1948 = shalt.err (!%p1945_p13)  }
  0xc1   : > { %s1949_s3 = scalar_lea.vmem %s295_s16, 16  ;;  %p1954_p6 = scmp.lt.s32.totalorder %s295_s16, %s2356_s24 }
  0xc2   : > { %p1950_p2 = scmp.ne.s32.totalorder %s295_s16, %s1949_s3  ;;  %p1955_p10 = scmp.lt.s32.totalorder %s2378_s19, %s1949_s3 }
  0xc4   : > { %p1956_p12 = por %p1955_p10, %p1954_p6 }
  0xc6   : > { %p1957_p5 = pnand %p1956_p12, %p1950_p2 }
  0xc8   : > { %1960 = shalt.err (!%p1957_p5)  }
  0xc9   : > { %297 = dma.hbm_to_vmem [thread:$0]  %s285_s20, 16, %s295_s16, [#allocation3] }
  0xca   : > { %s2431_s25 = sld [smem:[#allocation5 + %s314_s14]]  ;;  %s1460_s10 = sshll.u32 %s299_s28, 4 }
  0xcb   : > { %s301_s26 = scalar_lea.hbm %s2623_s1, %s1460_s10  ;;  %s2143_s30 = smov [#allocation2 + $0x5]  }
  0xcc   : > { %s326_s12 = sshll.u32 %s2143_s30, 4  ;;  %s1961_s2 = scalar_lea.hbm %s301_s26, 16  ;;  %s327_s12 = int_to_ptr.vmem [resolvable:$true] %s326_s12 }
  0xcd   : > { %p1962_p8 = scmp.ne.s32.totalorder %s301_s26, %s1961_s2  ;;  %p1964_p3 = scmp.lt.u32.totalorder %s301_s26, %s2623_s1 }
  0xce   : > { %p1965_p0 = scmp.lt.u32.totalorder %s2369_s9, %s1961_s2  ;;  %p1967_p7 = scmp.lt.u32.totalorder %s1961_s2, %s301_s26 }
  0xd0   : > { %p1966_p4 = por %p1965_p0, %p1964_p3 }
  0xd2   : > { %p1968_p9 = por %p1967_p7, %p1966_p4 }
  0xd4   : > { %p1969_p11 = pnand %p1968_p9, %p1962_p8 }
  0xd6   : > { %1972 = shalt.err (!%p1969_p11)  }
  0xd7   : > { %s1973_s16 = scalar_lea.vmem %s2423_s8, 16  ;;  %p1978_p2 = scmp.lt.s32.totalorder %s2423_s8, %s2356_s24 }
  0xd8   : > { %p1974_p13 = scmp.ne.s32.totalorder %s2423_s8, %s1973_s16  ;;  %p1979_p6 = scmp.lt.s32.totalorder %s2378_s19, %s1973_s16 }
  0xda   : > { %p1980_p10 = por %p1979_p6, %p1978_p2 }
  0xdc   : > { %p1981_p12 = pnand %p1980_p10, %p1974_p13 }
  0xde   : > { %1984 = shalt.err (!%p1981_p12)  }
  0xdf   : > { %313 = dma.hbm_to_vmem [thread:$0]  %s301_s26, 16, %s2423_s8, [#allocation3] }
  0xe0   : > { %s330_s28 = sadd.s32 6, %s2350_s27  ;;  %s1461_s20 = sshll.u32 %s2431_s25, 4 }
  0xe1   : > { %s2447_s14 = sld [smem:[#allocation5 + %s330_s28]]  ;;  %s2144_s23 = smov [#allocation2 + $0x6]  }
  0xe2   : > { %s342_s3 = sshll.u32 %s2144_s23, 4  ;;  %s317_s21 = scalar_lea.hbm %s2623_s1, %s1461_s20  ;;  %s343_s3 = int_to_ptr.vmem [resolvable:$true] %s342_s3 }
  0xe3   : > { %s346_s30 = sadd.s32 7, %s2350_s27  ;;  %s1985_s2 = scalar_lea.hbm %s317_s21, 16 }
  0xe4   : > { %p1986_p5 = scmp.ne.s32.totalorder %s317_s21, %s1985_s2  ;;  %p1988_p8 = scmp.lt.u32.totalorder %s317_s21, %s2623_s1 }
  0xe5   : > { %p1989_p3 = scmp.lt.u32.totalorder %s2369_s9, %s1985_s2  ;;  %p1991_p4 = scmp.lt.u32.totalorder %s1985_s2, %s317_s21 }
  0xe7   : > { %p1990_p0 = por %p1989_p3, %p1988_p8 }
  0xe9   : > { %p1992_p7 = por %p1991_p4, %p1990_p0 }
  0xeb   : > { %p1993_p9 = pnand %p1992_p7, %p1986_p5 }
  0xed   : > { %1996 = shalt.err (!%p1993_p9)  }
  0xee   : > { %s1997_s8 = scalar_lea.vmem %s327_s12, 16  ;;  %p2002_p13 = scmp.lt.s32.totalorder %s327_s12, %s2356_s24 }
  0xef   : > { %p1998_p11 = scmp.ne.s32.totalorder %s327_s12, %s1997_s8  ;;  %p2003_p2 = scmp.lt.s32.totalorder %s2378_s19, %s1997_s8 }
  0xf1   : > { %p2004_p6 = por %p2003_p2, %p2002_p13 }
  0xf3   : > { %p2005_p10 = pnand %p2004_p6, %p1998_p11 }
  0xf5   : > { %2008 = shalt.err (!%p2005_p10)  }
  0xf6   : > { %329 = dma.hbm_to_vmem [thread:$0]  %s317_s21, 16, %s327_s12, [#allocation3] }
  0xf7   : > { %s347_s27 = sld [smem:[#allocation5 + %s346_s30]]  ;;  %s1462_s25 = sshll.u32 %s2447_s14, 4 }
  0xf8   : > { %s2145_s26 = smov [#allocation2 + $0x7]   ;;  %s333_s23 = scalar_lea.hbm %s2623_s1, %s1462_s25 }
  0xf9   : > { %s358_s16 = sshll.u32 %s2145_s26, 4  ;;  %s2009_s10 = scalar_lea.hbm %s333_s23, 16  ;;  %s359_s16 = int_to_ptr.vmem [resolvable:$true] %s358_s16 }
  0xfa   : > { %p2010_p12 = scmp.ne.s32.totalorder %s333_s23, %s2009_s10  ;;  %p2012_p5 = scmp.lt.u32.totalorder %s333_s23, %s2623_s1 }
  0xfb   : > { %p2013_p8 = scmp.lt.u32.totalorder %s2369_s9, %s2009_s10  ;;  %p2015_p0 = scmp.lt.u32.totalorder %s2009_s10, %s333_s23 }
  0xfd   : > { %p2014_p3 = por %p2013_p8, %p2012_p5 }
  0xff   : > { %p2016_p4 = por %p2015_p0, %p2014_p3 }
 0x101   : > { %p2017_p7 = pnand %p2016_p4, %p2010_p12 }
 0x103   : > { %2020 = shalt.err (!%p2017_p7)  }
 0x104   : > { %s2021_s12 = scalar_lea.vmem %s343_s3, 16  ;;  %p2026_p11 = scmp.lt.s32.totalorder %s343_s3, %s2356_s24 }
 0x105   : > { %p2022_p9 = scmp.ne.s32.totalorder %s343_s3, %s2021_s12  ;;  %p2027_p13 = scmp.lt.s32.totalorder %s2378_s19, %s2021_s12 }
 0x107   : > { %p2028_p2 = por %p2027_p13, %p2026_p11 }
 0x109   : > { %p2029_p6 = pnand %p2028_p2, %p2022_p9 }
 0x10b   : > { %2032 = shalt.err (!%p2029_p6)  }
 0x10c   : > { %345 = dma.hbm_to_vmem [thread:$0]  %s333_s23, 16, %s343_s3, [#allocation3] }
 0x10d   : > { %s1463_s14 = sshll.u32 %s347_s27, 4 }
 0x10e   : > { %s349_s17 = scalar_lea.hbm %s2623_s1, %s1463_s14 }
 0x10f   : > { %s2033_s11 = scalar_lea.hbm %s349_s17, 16  ;;  %p2036_p12 = scmp.lt.u32.totalorder %s349_s17, %s2623_s1 }
 0x110   : > { %p2034_p10 = scmp.ne.s32.totalorder %s349_s17, %s2033_s11  ;;  %p2037_p5 = scmp.lt.u32.totalorder %s2369_s9, %s2033_s11 }
 0x111   : > { %p2039_p3 = scmp.lt.u32.totalorder %s2033_s11, %s349_s17 }
 0x112   : > { %p2038_p8 = por %p2037_p5, %p2036_p12 }
 0x114   : > { %p2040_p0 = por %p2039_p3, %p2038_p8 }
 0x116   : > { %p2041_p4 = pnand %p2040_p0, %p2034_p10 }
 0x118   : > { %2044 = shalt.err (!%p2041_p4)  }
 0x119   : > { %s2045_s3 = scalar_lea.vmem %s359_s16, 16  ;;  %p2050_p9 = scmp.lt.s32.totalorder %s359_s16, %s2356_s24 }
 0x11a   : > { %p2046_p7 = scmp.ne.s32.totalorder %s359_s16, %s2045_s3  ;;  %p2051_p11 = scmp.lt.s32.totalorder %s2378_s19, %s2045_s3 }
 0x11c   : > { %p2052_p13 = por %p2051_p11, %p2050_p9 }
 0x11e   : > { %p2053_p2 = pnand %p2052_p13, %p2046_p7 }
 0x120   : > { %2056 = shalt.err (!%p2053_p2)  }
 0x121   : > { %361 = dma.hbm_to_vmem [thread:$0]  %s349_s17, 16, %s359_s16, [#allocation3] }
 0x122   : > { %s2657_s27 = sshll.u32 %s2334_s29, 3 }
 0x123   : > { %s2481_s26 = scalar_lea.vmem [#allocation11], %s2657_s27 }
 0x124   : > { %2111 = dma.done.wait [#allocation3], 128 }
 0x125   : > { %2112 = vsyncadd [#allocation3], 4294967168  ;;  %v2483_v0 = vld [vmem:[#allocation2] sm:$0xff]  ;;  %v1680_v2 = vld [vmem:[#allocation9 + $0x4] ss:$36 sps:$4 sm:$0xff]   ;;  %v2146_v35 = vmov 0  }
 0x126   : > { %v380_v1 = vmul.f32 %v2483_v0, %v2483_v0  ;;  %v1682_v3 = vld [vmem:[#allocation9 + $0xc] ss:$36 sps:$4 sm:$0xff]   ;;  %v1684_v4 = vld [vmem:[#allocation9] ss:$36 sps:$4 sm:$0xff]   ;;  %886 = vmatprep.subr.bf16.mxu0 %v1680_v2  ;;  %v1688_v7 = vld [vmem:[#allocation9 + $0x54] ss:$36 sps:$4 sm:$0xff]   ;;  %918 = vmatprep.mubr.bf16.mxu0 %v2146_v35 }
 0x127   : > { %v1685_v5 = vld [vmem:[#allocation9 + $0x8] ss:$36 sps:$4 sm:$0xff]   ;;  %927 = vmatprep.subr.bf16.mxu1 %v1682_v3  ;;  %887 = vmatpush1.bf16.msra.mxu0 %v1684_v4  ;;  %v1691_v9 = vld [vmem:[#allocation9 + $0x50] ss:$36 sps:$4 sm:$0xff]   ;;  %v1694_v11 = vld [vmem:[#allocation9 + $0x9c] ss:$36 sps:$4 sm:$0xff]  }
 0x128   : > { %381 = vadd.xlane.f32.xlu0 %v380_v1  ;;  %v1686_v6 = vld [vmem:[#allocation9 + $0x4c] ss:$36 sps:$4 sm:$0xff]   ;;  %928 = vmatpush1.bf16.msra.mxu1 %v1685_v5  ;;  %v1692_v10 = vld [vmem:[#allocation9 + $0x94] ss:$36 sps:$4 sm:$0xff]   ;;  %v1698_v14 = vld [vmem:[#allocation9 + $0xdc] ss:$36 sps:$4 sm:$0xff]  }
 0x129   : > { %888 = vmatprep.subr.bf16.mxu0 %v1686_v6  ;;  %v1690_v8 = vld [vmem:[#allocation9 + $0x48] ss:$36 sps:$4 sm:$0xff]   ;;  %929 = vmatprep.subr.bf16.mxu1 %v1688_v7  ;;  %v1696_v12 = vld [vmem:[#allocation9 + $0x90] ss:$36 sps:$4 sm:$0xff]   ;;  %v1697_v13 = vld [vmem:[#allocation9 + $0x98] ss:$36 sps:$4 sm:$0xff]  }
 0x12a   : > { %v1700_v15 = vld [vmem:[#allocation9 + $0xe4] ss:$36 sps:$4 sm:$0xff]   ;;  %v1702_v16 = vld [vmem:[#allocation9 + $0xd8] ss:$36 sps:$4 sm:$0xff]   ;;  %v1706_v19 = vld [vmem:[#allocation9 + $0x12c] ss:$36 sps:$4 sm:$0xff]   ;;  %959 = vmatprep.mubr.bf16.mxu1 %v2146_v35 }
 0x12b   : > { %889 = vmatpush1.bf16.msra.mxu0 %v1690_v8  ;;  %v1703_v17 = vld [vmem:[#allocation9 + $0xe0] ss:$36 sps:$4 sm:$0xff]   ;;  %v1709_v21 = vld [vmem:[#allocation9 + $0x128] ss:$36 sps:$4 sm:$0xff]   ;;  %v1712_v23 = vld [vmem:[#allocation9 + $0x174] ss:$36 sps:$4 sm:$0xff]  }
 0x12c   : > { %930 = vmatpush1.bf16.msra.mxu1 %v1691_v9  ;;  %890 = vmatprep.subr.bf16.mxu0 %v1692_v10  ;;  %v1704_v18 = vld [vmem:[#allocation9 + $0x124] ss:$36 sps:$4 sm:$0xff]   ;;  %v1710_v22 = vld [vmem:[#allocation9 + $0x16c] ss:$36 sps:$4 sm:$0xff]   ;;  %v1716_v26 = vld [vmem:[#allocation9 + $0x1b4] ss:$36 sps:$4 sm:$0xff]  }
 0x12d   : > { %931 = vmatprep.subr.bf16.mxu1 %v1694_v11  ;;  %v1708_v20 = vld [vmem:[#allocation9 + $0x120] ss:$36 sps:$4 sm:$0xff]   ;;  %v1714_v24 = vld [vmem:[#allocation9 + $0x168] ss:$36 sps:$4 sm:$0xff]   ;;  %v1715_v25 = vld [vmem:[#allocation9 + $0x170] ss:$36 sps:$4 sm:$0xff]  }
 0x12e   : > { %v1718_v27 = vld [vmem:[#allocation9 + $0x1bc] ss:$36 sps:$4 sm:$0xff]   ;;  %v1720_v28 = vld [vmem:[#allocation9 + $0x1b0] ss:$36 sps:$4 sm:$0xff]   ;;  %v1724_v31 = vld [vmem:[#allocation9 + $0x204] ss:$36 sps:$4 sm:$0xff]  }
 0x12f   : > { %891 = vmatpush1.bf16.msra.mxu0 %v1696_v12  ;;  %v1721_v29 = vld [vmem:[#allocation9 + $0x1b8] ss:$36 sps:$4 sm:$0xff]   ;;  %v1727_v33 = vld [vmem:[#allocation9 + $0x200] ss:$36 sps:$4 sm:$0xff]   ;;  %s2147_s9 = smov 120   ;;  %v2148_v11 = vmov 0.0  }
 0x130   : > { %932 = vmatpush1.bf16.msra.mxu1 %v1697_v13  ;;  %892 = vmatprep.subr.bf16.mxu0 %v1698_v14  ;;  %v1722_v30 = vld [vmem:[#allocation9 + $0x1fc] ss:$36 sps:$4 sm:$0xff]   ;;  %v1730_v34 = vld [vmem:[#allocation9 + $0x14] ss:$36 sps:$4 sm:$0xff]   ;;  %v1739_v47 = vld [vmem:[#allocation9 + $0x64] ss:$36 sps:$4 sm:$0xff]  }
 0x131   : > { %933 = vmatprep.subr.bf16.mxu1 %v1700_v15  ;;  %v1726_v32 = vld [vmem:[#allocation9 + $0x1f8] ss:$36 sps:$4 sm:$0xff]   ;;  %v1728_v43 = vld [vmem:[#allocation9 + $0x10] ss:$36 sps:$4 sm:$0xff]   ;;  %v1737_v49 = vld [vmem:[#allocation9 + $0x60] ss:$36 sps:$4 sm:$0xff]  }
 0x132   : > { %v1733_v36 = vld [vmem:[#allocation9 + $0x1c] ss:$36 sps:$4 sm:$0xff]   ;;  %v1742_v50 = vld [vmem:[#allocation9 + $0xa4] ss:$36 sps:$4 sm:$0xff]   ;;  %v1745_v51 = vld [vmem:[#allocation9 + $0xac] ss:$36 sps:$4 sm:$0xff]  }
 0x133   : > { %893 = vmatpush1.bf16.msra.mxu0 %v1702_v16  ;;  %v2490_v37 = vld [vmem:[%s2338_s15] sm:$0xf]  ;;  %v1740_v52 = vld [vmem:[#allocation9 + $0xa0] ss:$36 sps:$4 sm:$0xff]   ;;  %v1743_v53 = vld [vmem:[#allocation9 + $0xa8] ss:$36 sps:$4 sm:$0xff]  }
 0x134   : > { %934 = vmatpush1.bf16.msra.mxu1 %v1703_v17  ;;  %894 = vmatprep.subr.bf16.mxu0 %v1704_v18  ;;  %v1537_v38 = vcombine.low %v2490_v37, %v2490_v37  ;;  %v1731_v44 = vld [vmem:[#allocation9 + $0x18] ss:$36 sps:$4 sm:$0xff]   ;;  %v1748_v54 = vld [vmem:[#allocation9 + $0xec] ss:$36 sps:$4 sm:$0xff]   ;;  %v1763_v63 = vld [vmem:[#allocation9 + $0x184] ss:$36 sps:$4 sm:$0xff]  }
 0x135   : > { %935 = vmatprep.subr.bf16.mxu1 %v1706_v19  ;;  %v1736_v46 = vld [vmem:[#allocation9 + $0x5c] ss:$36 sps:$4 sm:$0xff]   ;;  %v1751_v55 = vld [vmem:[#allocation9 + $0xf4] ss:$36 sps:$4 sm:$0xff]   ;;  %v1746_v56 = vld [vmem:[#allocation9 + $0xe8] ss:$36 sps:$4 sm:$0xff]  }
 0x136   : > { %v1734_v48 = vld [vmem:[#allocation9 + $0x58] ss:$36 sps:$4 sm:$0xff]   ;;  %v1749_v57 = vld [vmem:[#allocation9 + $0xf0] ss:$36 sps:$4 sm:$0xff]   ;;  %v1761_v1 = vld [vmem:[#allocation9 + $0x180] ss:$36 sps:$4 sm:$0xff]  }
 0x137   : > { %895 = vmatpush1.bf16.msra.mxu0 %v1708_v20  ;;  %v1754_v58 = vld [vmem:[#allocation9 + $0x134] ss:$36 sps:$4 sm:$0xff]   ;;  %v1757_v59 = vld [vmem:[#allocation9 + $0x13c] ss:$36 sps:$4 sm:$0xff]   ;;  %v1766_v2 = vld [vmem:[#allocation9 + $0x1c4] ss:$36 sps:$4 sm:$0xff]  }
 0x138   : > { %936 = vmatpush1.bf16.msra.mxu1 %v1709_v21  ;;  %896 = vmatprep.subr.bf16.mxu0 %v1710_v22  ;;  %v1752_v60 = vld [vmem:[#allocation9 + $0x130] ss:$36 sps:$4 sm:$0xff]   ;;  %v1755_v61 = vld [vmem:[#allocation9 + $0x138] ss:$36 sps:$4 sm:$0xff]   ;;  %v1764_v4 = vld [vmem:[#allocation9 + $0x1c0] ss:$36 sps:$4 sm:$0xff]  }
 0x139   : > { %937 = vmatprep.subr.bf16.mxu1 %v1712_v23  ;;  %v1760_v62 = vld [vmem:[#allocation9 + $0x17c] ss:$36 sps:$4 sm:$0xff]   ;;  %v1769_v3 = vld [vmem:[#allocation9 + $0x1cc] ss:$36 sps:$4 sm:$0xff]   ;;  %v1775_v7 = vld [vmem:[#allocation9 + $0x214] ss:$36 sps:$4 sm:$0xff]  }
 0x13a   : > { %v1767_v5 = vld [vmem:[#allocation9 + $0x1c8] ss:$36 sps:$4 sm:$0xff]   ;;  %v1773_v9 = vld [vmem:[#allocation9 + $0x210] ss:$36 sps:$4 sm:$0xff]   ;;  %v1776_v10 = vld [vmem:[#allocation9 + $0x20] ss:$36 sps:$4 sm:$0xff]  }
 0x13b   : > { %897 = vmatpush1.bf16.msra.mxu0 %v1714_v24  ;;  %v1772_v6 = vld [vmem:[#allocation9 + $0x20c] ss:$36 sps:$4 sm:$0xff]   ;;  %vm2149_vm0 = vmmov 0   ;;  %v1779_v14 = vld [vmem:[#allocation9 + $0xf8] ss:$36 sps:$4 sm:$0xff]   ;;  %vm1105_vm1 = vcmask 1043456  }
 0x13c   : > { %938 = vmatpush1.bf16.msra.mxu1 %v1715_v25  ;;  %898 = vmatprep.subr.bf16.mxu0 %v1716_v26  ;;  %v1770_v8 = vld [vmem:[#allocation9 + $0x208] ss:$36 sps:$4 sm:$0xff]   ;;  %v1778_v13 = vld [vmem:[#allocation9 + $0xb0] ss:$36 sps:$4 sm:$0xff]   ;;  %v1780_v15 = vld [vmem:[#allocation9 + $0x140] ss:$36 sps:$4 sm:$0xff]  }
 0x13d   : > { %939 = vmatprep.subr.bf16.mxu1 %v1718_v27  ;;  %v1777_v12 = vld [vmem:[#allocation9 + $0x68] ss:$36 sps:$4 sm:$0xff]   ;;  %v1782_v17 = vld [vmem:[#allocation9 + $0x1d0] ss:$36 sps:$4 sm:$0xff]   ;;  %v1783_v18 = vld [vmem:[#allocation9 + $0x218] ss:$36 sps:$4 sm:$0xff]   ;;  %v473_v27 = vlaneseq }
 0x13e   : > { %1099 = vrot.lane.b32.xlu0 %v1537_v38, %s2147_s9  ;;  %v1781_v16 = vld [vmem:[#allocation9 + $0x188] ss:$36 sps:$4 sm:$0xff]   ;;  %vm1101_vm2 = vcmask 64512   ;;  %s1547_s23 = sshll.u32 %s2219_s0, 7  ;;  %s1343_s10 = sshll.u32 %s2481_s26, 4  ;;  %s2579_s10 = int_to_ptr.vmem [resolvable:$true] %s1343_s10 }
 0x13f   : > { %899 = vmatpush1.bf16.msra.mxu0 %v1720_v28  ;;  %v2519_v28 = vshrl.u32 %v473_v27, 7  ;;  %s2577_s12 = scalar_lea.hbm %s2628_s6, %s1547_s23  ;;  %s1330_s14 = scalar_lea.sflag [#allocation8], %s2334_s29 }
 0x140   : > { %940 = vmatpush1.bf16.msra.mxu1 %v1721_v29  ;;  %900 = vmatprep.subr.bf16.mxu0 %v1722_v30  ;;  %v2525_v30 = vld [vmem:[%s2626_s4] sm:$0xff]  ;;  %s2057_s21 = scalar_lea.vmem %s2579_s10, 128  ;;  %s2150_s0 = smov [#allocation11]  }
 0x141   : > { %941 = vmatprep.subr.bf16.mxu1 %v1724_v31  ;;  %v487_v29 = vsub.s32 3, %v2519_v28  ;;  %p2058_p6 = scmp.ne.s32.totalorder %s2579_s10, %s2057_s21  ;;  %s2061_s30 = sshll.u32 %s2150_s0, 4  ;;  %s2062_s30 = int_to_ptr.vmem [resolvable:$false] %s2061_s30 }
 0x142   : > { %s2063_s17 = scalar_lea.vmem %s2062_s30, 256  ;;  %p2064_p5 = scmp.lt.s32.totalorder %s2579_s10, %s2062_s30 }
 0x143   : > { %901 = vmatpush1.bf16.msra.mxu0 %v1726_v32  ;;  %v488_v31 = vrot.slane %v2525_v30, %v487_v29  ;;  %v491_v32 = vsub.s32 4, %v2519_v28  ;;  %p2059_p10 = pnand %p2058_p6, %p2289_p1  ;;  %p2065_p8 = scmp.lt.s32.totalorder %s2063_s17, %s2057_s21 }
 0x144   : > { %942 = vmatpush1.bf16.msra.mxu1 %v1727_v33  ;;  %968 = vmatprep.subr.bf16.mxu0 %v1730_v34  ;;  %v495_v33 = vsub.s32 5, %v2519_v28  ;;  %v479_v34 = vsub.s32 1, %v2519_v28 }
 0x145   : > { %1009 = vmatprep.subr.bf16.mxu1 %v1733_v36  ;;  %v492_v38 = vrot.slane %v2525_v30, %v491_v32  ;;  %p2060_p12 = pneg %p2059_p10  ;;  %p2066_p3 = por %p2065_p8, %p2064_p5 }
 0x147   : > { %p2067_p0 = pnand %p2066_p3, %p2060_p12 }
 0x1b5   : > { %v382_v39 = vpop.xlane.xlu0 %381 }
 0x1b6   : > { %v383_v40 = vmax.f32 %v382_v39, 1e-24  ;;  %v496_v39 = vrot.slane %v2525_v30, %v495_v33 }
 0x1b8   : > { %1785 = vrsqrt.f32 %v383_v40 }
 0x1c2   : > { %v1786_v41 = vpop.eup %1785 }
 0x1c3   : > { %v2495_v42 = vmul.f32 %v1786_v41, %v2483_v0  ;;  %v1758_v0 = vld [vmem:[#allocation9 + $0x178] ss:$36 sps:$4 sm:$0xff]   ;;  %v475_v41 = vsub.s32 0, %v2519_v28 }
 0x1c5   : > { %v2499_v45 = vpack.c.bf16 %v2495_v42, %v2495_v42 }
 0x1c7   : > { %919 = vmatmul.mubr.bf16.vlgmr.msra.gmra.mrb[0].mxu0 %v2499_v45  ;;  %960 = vmatmul.mubr.bf16.vlgmr.msra.gmra.mrb[0].mxu1 %v2499_v45 }
 0x1c8   : > { %969 = vmatpush1.bf16.msra.mxu0 %v1728_v43  ;;  %1010 = vmatpush1.bf16.msra.mxu1 %v1731_v44  ;;  %v480_v43 = vrot.slane %v2525_v30, %v479_v34 }
 0x1c9   : > { %970 = vmatprep.subr.bf16.mxu0 %v1736_v46  ;;  %1011 = vmatprep.subr.bf16.mxu1 %v1739_v47 }
 0x1ca   : > { %1000 = vmatprep.mubr.bf16.mxu0 %v2146_v35  ;;  %1041 = vmatprep.mubr.bf16.mxu1 %v2146_v35 }
 0x1cc   : > { %971 = vmatpush1.bf16.msra.mxu0 %v1734_v48  ;;  %1012 = vmatpush1.bf16.msra.mxu1 %v1737_v49 }
 0x1cd   : > { %972 = vmatprep.subr.bf16.mxu0 %v1742_v50  ;;  %1013 = vmatprep.subr.bf16.mxu1 %v1745_v51  ;;  %v476_v51 = vrot.slane %v2525_v30, %v475_v41 }
 0x1d0   : > { %973 = vmatpush1.bf16.msra.mxu0 %v1740_v52  ;;  %1014 = vmatpush1.bf16.msra.mxu1 %v1743_v53 }
 0x1d1   : > { %974 = vmatprep.subr.bf16.mxu0 %v1748_v54  ;;  %1015 = vmatprep.subr.bf16.mxu1 %v1751_v55  ;;  %v1100_v55 = vpop.permute.xlu0 %1099 }
 0x1d4   : > { %975 = vmatpush1.bf16.msra.mxu0 %v1746_v56  ;;  %1016 = vmatpush1.bf16.msra.mxu1 %v1749_v57  ;;  %v483_v57 = vsub.s32 2, %v2519_v28 }
 0x1d5   : > { %976 = vmatprep.subr.bf16.mxu0 %v1754_v58  ;;  %1017 = vmatprep.subr.bf16.mxu1 %v1757_v59 }
 0x1d8   : > { %977 = vmatpush1.bf16.msra.mxu0 %v1752_v60  ;;  %1018 = vmatpush1.bf16.msra.mxu1 %v1755_v61  ;;  %v484_v61 = vrot.slane %v2525_v30, %v483_v57 }
 0x1d9   : > { %978 = vmatprep.subr.bf16.mxu0 %v1760_v62  ;;  %1019 = vmatprep.subr.bf16.mxu1 %v1763_v63 }
 0x1dc   : > { %979 = vmatpush1.bf16.msra.mxu0 %v1758_v0  ;;  %1020 = vmatpush1.bf16.msra.mxu1 %v1761_v1 }
 0x1dd   : > { %980 = vmatprep.subr.bf16.mxu0 %v1766_v2  ;;  %1021 = vmatprep.subr.bf16.mxu1 %v1769_v3 }
 0x1e0   : > { %981 = vmatpush1.bf16.msra.mxu0 %v1764_v4  ;;  %1022 = vmatpush1.bf16.msra.mxu1 %v1767_v5 }
 0x1e1   : > { %982 = vmatprep.subr.bf16.mxu0 %v1772_v6  ;;  %1023 = vmatprep.subr.bf16.mxu1 %v1775_v7  ;;  %v499_v7 = vsub.s32 6, %v2519_v28 }
 0x1e4   : > { %983 = vmatpush1.bf16.msra.mxu0 %v1770_v8  ;;  %1024 = vmatpush1.bf16.msra.mxu1 %v1773_v9 }
 0x1e5   : > { %1564 = vmatprep.subr.bf16.mxu0 %v2148_v11 }
 0x1e7   : > { %1001 = vmatmul.mubr.bf16.vlgmr.msra.gmra.mrb[4].mxu0 %v2499_v45  ;;  %1042 = vmatmul.mubr.bf16.vlgmr.msra.gmra.mrb[4].mxu1 %v2499_v45 }
 0x1e8   : > { %1565 = vmatpush3.bf16.msra.mxu0 %v1776_v10  ;;  %1580 = vmatprep.mubr.msk.bf16.mxu0 %vm2149_vm0, %v2148_v11  ;;  %v469_v10 = vld [vmem:[%s2627_s5] sm:$0x7] }
 0x1e9   : > { %1566 = vmatprep.subr.bf16.mxu0 %v2148_v11  ;;  %1147 = vmatprep.mubr.bf16.mxu1 %v2146_v35 }
 0x1ec   : > { %1567 = vmatpush3.bf16.msra.mxu0 %v1777_v12  ;;  %v500_v12 = vrot.slane %v2525_v30, %v499_v7 }
 0x1ed   : > { %1568 = vmatprep.subr.bf16.mxu0 %v2148_v11 }
 0x1f0   : > { %1569 = vmatpush3.bf16.msra.mxu0 %v1778_v13  ;;  %v503_v13 = vsub.s32 7, %v2519_v28  ;;  %v1301_v28 = vrot.slane %v469_v10, %v483_v57 }
 0x1f1   : > { %1570 = vmatprep.subr.bf16.mxu0 %v2148_v11 }
 0x1f4   : > { %1571 = vmatpush3.bf16.msra.mxu0 %v1779_v14 }
 0x1f5   : > { %1572 = vmatprep.subr.bf16.mxu0 %v2148_v11 }
 0x1f8   : > { %1573 = vmatpush3.bf16.msra.mxu0 %v1780_v15 }
 0x1f9   : > { %1574 = vmatprep.subr.bf16.mxu0 %v2148_v11 }
 0x1fc   : > { %1575 = vmatpush3.bf16.msra.mxu0 %v1781_v16 }
 0x1fd   : > { %1576 = vmatprep.subr.bf16.mxu0 %v2148_v11 }
 0x200   : > { %1577 = vmatpush3.bf16.msra.mxu0 %v1782_v17 }
 0x201   : > { %1578 = vmatprep.subr.bf16.mxu0 %v2148_v11 }
 0x204   : > { %1579 = vmatpush3.bf16.msra.mxu0 %v1783_v18  ;;  %v504_v18 = vrot.slane %v2525_v30, %v503_v13  ;;  %v1464_v30 = vld [vmem:[%s2626_s4 + $0x8] ss:$0 sm:$0xff] }
 0x207   : > { %1581 = vmatmul.mubr.bf16.vlgmr.msra.gmra.mrb[8].mxu0 %v2499_v45 }
 0x29a   : > { %v920_v19 = vpop.f32.mrb[0].mxu0  ;;  %v961_v20 = vpop.f32.mrb[0].mxu1 }
 0x29b   : > { %v922_v21 = vpop.f32.mrb[1].mxu0  ;;  %v963_v22 = vpop.f32.mrb[1].mxu1  ;;  %v921_v56 = vadd.f32 %v920_v19, %v476_v51  ;;  %v962_v63 = vadd.f32 %v961_v20, %v484_v61 }
 0x29c   : > { %v924_v23 = vpop.f32.mrb[2].mxu0  ;;  %v965_v24 = vpop.f32.mrb[2].mxu1  ;;  %v964_v36 = vadd.f32 %v963_v22, %v488_v31  ;;  %v923_v52 = vadd.f32 %v922_v21, %v480_v43  ;;  %v1297_v21 = vrot.slane %v469_v10, %v479_v34 }
 0x29d   : > { %v925_v25 = vpop.f32.mrb[3].mxu0  ;;  %v966_v26 = vpop.f32.mrb[3].mxu1  ;;  %v1090_v60 = vpack.c.bf16 %v921_v56, %v921_v56  ;;  %v1092_v0 = vpack.c.bf16 %v962_v63, %v962_v63 }
 0x29e   : > { %v1093_v44 = vpack.c.bf16 %v964_v36, %v964_v36  ;;  %v1091_v58 = vpack.c.bf16 %v923_v52, %v923_v52 }
 0x29f   : > { %v1200_v62 = vsel %vm1105_vm1, %v1090_v60, 0  ;;  %v1206_v1 = vsel %vm1105_vm1, %v1092_v0, 0 }
 0x2a0   : > { %v1107_v53 = vsel %vm1105_vm1, %v1093_v44, 0 }
 0x2ba   : > { %v1002_v40 = vpop.f32.mrb[4].mxu0 }
 0x2bb   : > { %v1003_v45 = vadd.f32 %v1002_v40, %v492_v38  ;;  %v1004_v46 = vpop.f32.mrb[5].mxu0 }
 0x2bc   : > { %v1005_v47 = vadd.f32 %v1004_v46, %v496_v39  ;;  %v1006_v48 = vpop.f32.mrb[6].mxu0 }
 0x2bd   : > { %v1094_v49 = vpack.c.bf16 %v1003_v45, %v1003_v45  ;;  %v1007_v50 = vpop.f32.mrb[7].mxu0 }
 0x2be   : > { %v1095_v54 = vpack.c.bf16 %v1005_v47, %v1005_v47 }
 0x2bf   : > { %1538 = vmatprep.subr.msk.bf16.mxu1 %vm1105_vm1, %v1094_v49 }
 0x2c0   : > { %1116 = vmatpush1.bf16.msra.mxu1 %v1107_v53  ;;  %v1113_v59 = vsel %vm1105_vm1, %v1095_v54, 0 }
 0x2c1   : > { %1584 = vmatprep.subr.bf16.mxu1 %v2148_v11 }
 0x2c3   : > { %1539 = vmatmul.mubr.msk.bf16.vlgmr.msra.gmra.mrb[4].mxu1 %vm1101_vm2, %v1100_v55 }
 0x2c4   : > { %1585 = vmatpush3.bf16.msra.mxu1 %v1113_v59  ;;  %1586 = vmatprep.mubr.msk.bf16.mxu1 %vm2149_vm0, %v2148_v11 }
 0x2c5   : > { %1541 = vmatprep.subr.msk.bf16.mxu1 %vm1105_vm1, %v1091_v58 }
 0x2cb   : > { %1587 = vmatmul.mubr.msk.bf16.vlgmr.msra.gmra.mrb[8].mxu1 %vm1101_vm2, %v1100_v55 }
 0x2cc   : > { %1209 = vmatpush1.bf16.msra.mxu1 %v1200_v62  ;;  %1240 = vmatprep.mubr.bf16.mxu1 %v2146_v35 }
 0x2cd   : > { %1590 = vmatprep.subr.bf16.mxu1 %v2148_v11 }
 0x2d3   : > { %1542 = vmatmul.mubr.msk.bf16.vlgmr.msra.gmra.mrb[4].mxu1 %vm1101_vm2, %v2490_v37 }
 0x2d4   : > { %1591 = vmatpush3.bf16.msra.mxu1 %v1206_v1  ;;  %1592 = vmatprep.mubr.msk.bf16.mxu1 %vm2149_vm0, %v2148_v11  ;;  %v1293_v11 = vrot.slane %v469_v10, %v475_v41 }
 0x2da   : > { %v1084_v2 = vpop.f32.mrb[8].mxu0 }
 0x2db   : > { %v1582_v3 = vpop.f32.mrb[9].mxu0  ;;  %1593 = vmatmul.mubr.msk.bf16.vlgmr.msra.gmra.mrb[12].mxu1 %vm1101_vm2, %v2490_v37  ;;  %v1085_v36 = vadd.f32 %v1464_v30, %v1084_v2 }
 0x2dc   : > { %v1087_v4 = vpop.f32.mrb[10].mxu0 }
 0x2dd   : > { %v1583_v5 = vpop.f32.mrb[11].mxu0 }
 0x39e   : > { %v1190_v35 = vpop.f32.mrb[8].mxu1 }
 0x39f   : > { %v1588_v6 = vpop.f32.mrb[9].mxu1 }
 0x3a0   : > { %v1193_v8 = vpop.f32.mrb[10].mxu1 }
 0x3a1   : > { %v1589_v9 = vpop.f32.mrb[11].mxu1 }
 0x3a6   : > { %v1242_v14 = vpop.f32.mrb[4].mxu1 }
 0x3a7   : > { %v1596_v15 = vadd.f32 %v1242_v14, %v500_v12  ;;  %v1244_v37 = vpop.f32.mrb[5].mxu1 }
 0x3a8   : > { %v1246_v16 = vpop.f32.mrb[6].mxu1  ;;  %v1598_v22 = vadd.f32 %v1244_v37, %v504_v18 }
 0x3a9   : > { %v1597_v17 = vadd.f32 %v1596_v15, %v1293_v11  ;;  %v1247_v19 = vpop.f32.mrb[7].mxu1 }
 0x3aa   : > { %v1599_v27 = vadd.f32 %v1598_v22, %v1297_v21 }
 0x3ab   : > { %v1544_v20 = vmul.f32 -1.442695, %v1597_v17 }
 0x3ac   : > { %v1545_v31 = vmul.f32 -1.442695, %v1599_v27 }
 0x3ad   : > { %1787 = vpow2.f32 %v1544_v20 }
 0x3ae   : > { %v1283_v23 = vpop.f32.mrb[12].mxu1  ;;  %1789 = vpow2.f32 %v1545_v31 }
 0x3af   : > { %v1284_v24 = vadd.f32 %v1283_v23, %v1190_v35  ;;  %v1594_v25 = vpop.f32.mrb[13].mxu1 }
 0x3b0   : > { %v1286_v26 = vpop.f32.mrb[14].mxu1 }
 0x3b1   : > { %v1595_v29 = vpop.f32.mrb[15].mxu1  ;;  %v1307_v39 = vadd.f32 %v1301_v28, %v1284_v24 }
 0x3b7   : > { %v1788_v32 = vpop.eup %1787 }
 0x3b8   : > { %v1312_v33 = vadd.f32 1.0, %v1788_v32  ;;  %v1790_v34 = vpop.eup %1789 }
 0x3b9   : > { %v1319_v41 = vadd.f32 1.0, %v1790_v34 }
 0x3ba   : > { %1791 = vrcp.f32 %v1312_v33 }
 0x3c4   : > { %v1792_v38 = vpop.eup %1791 }
 0x3c5   : > { %v1322_v40 = vmul.f32 %v1792_v38, %v1085_v36 }
 0x3c7   : > { %v1323_v43 = vadd.f32 %v1322_v40, %v1307_v39 }
 0x3c9   : > { %1793 = vtanh.f32 %v1323_v43 }
 0x3ca   : > { %1795 = vrcp.f32 %v1319_v41 }
 0x3d3   : > { %v1794_v44 = vpop.eup %1793 }
 0x3d4   : > { %v1325_v45 = vsub.f32 %v2495_v42, %v1794_v44  ;;  %v1796_v46 = vpop.eup %1795 }
 0x3d6   : > { %v1326_v47 = vmul.f32 %v1796_v46, %v1325_v45 }
 0x3d8   : > { %v1327_v48 = vadd.f32 %v1794_v44, %v1326_v47 }
 0x3da   : > { %1328 = vst [vmem:[%s2481_s26] sm:$0xff] %v1327_v48 }
 0x3db   : > { %2070 = shalt.err (!%p2067_p0)
}
 0x3dc   : > { %s2071_s29 = scalar_lea.hbm %s2577_s12, 128  ;;  %s2075_s25 = scalar_lea.hbm %s2628_s6, 256 }
 0x3dd   : > { %p2072_p4 = scmp.ne.s32.totalorder %s2577_s12, %s2071_s29  ;;  %p2076_p11 = scmp.lt.u32.totalorder %s2577_s12, %s2628_s6 }
 0x3de   : > { %p2077_p13 = scmp.lt.u32.totalorder %s2075_s25, %s2071_s29  ;;  %p2079_p6 = scmp.lt.u32.totalorder %s2071_s29, %s2577_s12 }
 0x3df   : > { %p2073_p7 = pnand %p2072_p4, %p2289_p1 }
 0x3e0   : > { %p2078_p2 = por %p2077_p13, %p2076_p11 }
 0x3e1   : > { %p2074_p9 = pneg %p2073_p7 }
 0x3e2   : > { %p2080_p10 = por %p2079_p6, %p2078_p2 }
 0x3e4   : > { %p2081_p12 = pnand %p2080_p10, %p2074_p9 }
 0x3e6   : > { %2084 = shalt.err (!%p2081_p12)
}
 0x3e7   : > { %1614 = dma.vmem_to_hbm [thread:$0]  (%p2289_p1), %s2579_s10, 128, %s2577_s12, %s1330_s14  }
 0x3e8 PF: > { %s2658_s26 = sld [smem:[#allocation37_spill]]  ;;  %s1355_s9 = sand.u32 1, %s2119_s7  }
 0x3e9   : > { %p2659_p5 = scmp.ne.s32.totalorder %s2643_s13, 0  ;;  %s1356_s15 = scalar_lea.sflag [#allocation8], %s1355_s9 }
 0x3ee   : > { %p2660_p8 = scmp.ge.s32.totalorder %s2658_s26, 2 }
 0x3f0   : > { %p1625_p3 = pnand %p2660_p8, %p2659_p5 }
 0x3f2   : > { %2114 = dma.done.wait (!%p1625_p3), %s1356_s15, 128  }
 0x3f3   : > { %2116 = vsyncadd (!%p1625_p3), %s1356_s15, 4294967168  ;;  %s2661_s10 = sld [smem:[#allocation38_spill]]  ;;  %s2662_s7 = sld [smem:[#allocation35_spill]] }
 0x3f4   : > { %s2663_s8 = sld [smem:[#allocation36_spill]]  ;;  %s2664_s9 = sld [smem:[#allocation39_spill]] }
 0x3f9   : > { %p24_p0 = scmp.ge.s32.totalorder %s2661_s10, 4  }
 0x3fb   :  { %26 = sbr.rel (!%p24_p0) target bundleno = 19 (0x13), region = 132 }
 0x402   :  { %1361 = vsyncpa [#allocation7], 1 }
 0x403   :  { %1363 = vsyncpa [#allocation7 + $0x1], 1 }
 0x404   :  { %1364 = vsyncpa [#allocation10], 1 }
 0x405   :  { %1365 = vsyncpa [#allocation8], 1 }
 0x406   :  { %1367 = vsyncpa [#allocation8 + $0x1], 1 }
 0x407   :  { %1368 = vsyncmov [#allocation3] }
 0x40a   :  { %s1369_s13 = vpop.sfrf %1368 }
 0x40b   :  { %p1550_p1 = scmp.ne.s32.totalorder %s1369_s13, 0 }
 0x40d   :  { %1373 = shalt.err (%p1550_p1)  }

</bundles_post_ra>
